<compile_context>
chip_gen: v7x
topology: tpu7x:2x2x1
jax: 0.10.0
libtpu: 0.0.40
codegen_flags: <defaults>
</compile_context>

<pallas_src>
import jax
import jax.numpy as jnp
from jax.experimental import pallas as pl
from jax.experimental.pallas import tpu as pltpu


def _round_up(x, m):
    return ((x + m - 1) // m) * m


# ----------------------------------------------------------------------------
# Fused kernel builder: upsample + pad + concat + (conv3x3 -> BN -> ReLU) * 2
# ----------------------------------------------------------------------------
def _make_fused_up_double_conv(N, nb, ch_half, cout, H, W, hw_small, cdt):
    HW = H * W
    in_ch = 2 * ch_half
    n_steps = N // nb

    # Flat, zero-haloed image layout along the lane axis:
    #   image q's pixel (r, c) lives at lane GAP + q*SL + r*W + c.
    # GAP/SL are 128-aligned so every image-region store is aligned/unmasked;
    # SL >= HW + W + 1 keeps one image's 3x3 halo reads inside its own slot.
    GAP = max(128, _round_up(W + 1, 128))
    SL = _round_up(HW + W + 1, 128)
    LV = _round_up(GAP + (nb - 1) * SL + HW + W + 1, 128)
    span = (nb - 1) * SL + HW          # lanes in one tap slice / conv result

    assert GAP >= W + 1, "left halo too small"
    assert SL >= HW + W + 1, "inter-image gap too small"
    assert GAP - (W + 1) >= 0 and GAP + W + 1 + span <= LV, "halo out of range"

    # Lanes never written by the per-image stores -> zeroed each step (cheap).
    halo = [(0, GAP)]
    for q in range(nb):
        lo = GAP + q * SL + HW
        hi = GAP + (q + 1) * SL if q < nb - 1 else LV
        halo.append((lo, hi))

    def kernel(xl_ref, xr_ref, upm_ref, w1_ref, b1_ref, w2_ref, b2_ref,
               o_ref, xv1_ref, xv2_ref):
        # (1) Zero ONLY the halo/gap lanes.  Image regions are fully
        #     overwritten below so they never need clearing.  Unconditional
        #     (not pl.when(program_id==0)): a "parallel" grid may be split
        #     across TensorCores with private scratch, so step 0 may never
        #     run on a given core.
        for lo, hi in halo:
            xv1_ref[:, lo:hi] = jnp.zeros((in_ch, hi - lo), cdt)
            xv2_ref[:, lo:hi] = jnp.zeros((cout, hi - lo), cdt)

        # (2) Bilinear x2 upsample + center zero-pad of x_r as ONE MXU matmul
        #     per image (no gathers, no XLA pad), and
        # (3) torch.cat([x_l, x_r], dim=1) == adjacent sublane rows.
        for q in range(nb):
            base = GAP + q * SL
            x_up = jnp.dot(xr_ref[q], upm_ref[...],
                           preferred_element_type=jnp.float32)  # (ch_half, HW)
            xv1_ref[0:ch_half, base:base + HW] = xl_ref[q].astype(cdt)
            xv1_ref[ch_half:in_ch, base:base + HW] = x_up.astype(cdt)

        # Column masks for the 3x3 left/right wrap-around, applied to the
        # (cout, span) per-tap results in f32 (cheaper than masking the
        # cin-row taps; keeps the elementwise epilogue in f32 for v5e).
        lane = jax.lax.broadcasted_iota(jnp.int32, (1, span), 1)
        colw = (lane % SL) % W
        mask_l = (colw != 0).astype(jnp.float32)
        mask_r = (colw != W - 1).astype(jnp.float32)

        def conv3x3_bn_relu(xv_ref, w_ref, b_ref):
            # 9 per-tap partial matmuls accumulated in f32: no im2col concat,
            # taps are lane-shifted slices of the haloed scratch, MXU operands
            # in `cdt` (bf16 by default).
            acc = jnp.zeros((cout, span), jnp.float32)
            for kh in range(3):
                for kw in range(3):
                    off = GAP + (kh - 1) * W + (kw - 1)
                    tap = xv_ref[:, off:off + span]
                    y = jnp.dot(w_ref[kh * 3 + kw], tap,
                                preferred_element_type=jnp.float32)
                    if kw == 0:
                        y = y * mask_l
                    elif kw == 2:
                        y = y * mask_r
                    acc = acc + y
            return jnp.maximum(acc + b_ref[...], 0.0)   # folded BN bias + ReLU

        # conv1 -> intermediate never leaves VMEM -> conv2
        h1 = conv3x3_bn_relu(xv1_ref, w1_ref, b1_ref)
        for q in range(nb):
            base = GAP + q * SL
            xv2_ref[:, base:base + HW] = h1[:, q * SL:q * SL + HW].astype(cdt)

        h2 = conv3x3_bn_relu(xv2_ref, w2_ref, b2_ref)
        for q in range(nb):                              # lane-dense f32 stores
            o_ref[q] = h2[:, q * SL:q * SL + HW].astype(o_ref.dtype)

    # NOTE: at real U-Net widths (cin ~ 512+) add vmem_limit_bytes and tile the
    # HW axis; at this size everything fits the default scoped VMEM everywhere.
    return pl.pallas_call(
        kernel,
        out_shape=jax.ShapeDtypeStruct((N, cout, HW), jnp.float32),
        grid=(n_steps,),
        in_specs=[
            pl.BlockSpec((nb, ch_half, HW), lambda s: (s, 0, 0)),        # x_l
            pl.BlockSpec((nb, ch_half, hw_small), lambda s: (s, 0, 0)),  # x_r (small)
            pl.BlockSpec((hw_small, HW), lambda s: (0, 0)),              # upsample mat
            pl.BlockSpec((9, cout, in_ch), lambda s: (0, 0, 0)),         # conv1 taps
            pl.BlockSpec((cout, 1), lambda s: (0, 0)),                   # conv1 bias
            pl.BlockSpec((9, cout, cout), lambda s: (0, 0, 0)),          # conv2 taps
            pl.BlockSpec((cout, 1), lambda s: (0, 0)),                   # conv2 bias
        ],
        out_specs=pl.BlockSpec((nb, cout, HW), lambda s: (s, 0, 0)),
        scratch_shapes=[pltpu.VMEM((in_ch, LV), cdt),   # conv1 input (x_l ++ x_up)
                        pltpu.VMEM((cout, LV), cdt)],   # conv2 input (h1)
        compiler_params=pltpu.CompilerParams(
            dimension_semantics=("parallel",)),
    )


# ----------------------------------------------------------------------------
# Trace-time parameter folding / packing (host side)
# ----------------------------------------------------------------------------
def fold_bn(conv_bias, gamma, beta, running_mean, running_var, eps=1e-5):
    s = gamma / jnp.sqrt(running_var + eps)
    b = (conv_bias - running_mean) * s + beta
    return s, b


def pack_weight_taps(w_hwio, scale, dtype):
    """(3,3,Cin,Cout) HWIO -> (9, Cout, Cin), BN scale folded, cast to dtype."""
    _, _, cin, cout = w_hwio.shape
    w = w_hwio * scale[None, None, None, :]
    w = jnp.transpose(w, (0, 1, 3, 2)).reshape(9, cout, cin)
    return w.astype(dtype)


def upsample_pad_matrix(hs, ws, Ht, Wt):
    """Matrix M (hs*ws, Ht*Wt): x_flat @ M == pad(bilinear_x2(x), to (Ht,Wt))."""
    def interp_mat(n_in):
        n_out = 2 * n_in
        src = (jnp.arange(n_out, dtype=jnp.float32)
               * (n_in - 1) / max(n_out - 1, 1))
        lo = jnp.clip(jnp.floor(src).astype(jnp.int32), 0, n_in - 1)
        hi = jnp.clip(lo + 1, 0, n_in - 1)
        fr = src - lo.astype(jnp.float32)
        return (jax.nn.one_hot(lo, n_in) * (1.0 - fr)[:, None]
                + jax.nn.one_hot(hi, n_in) * fr[:, None])     # (n_out, n_in)

    dh, dw = Ht - 2 * hs, Wt - 2 * ws
    assert dh >= 0 and dw >= 0, "x_r upsampled larger than x_l"
    Wy = jnp.pad(interp_mat(hs), ((dh // 2, dh - dh // 2), (0, 0)))  # (Ht, hs)
    Wx = jnp.pad(interp_mat(ws), ((dw // 2, dw - dw // 2), (0, 0)))  # (Wt, ws)
    M = jnp.einsum('ia,jb->ijab', Wy, Wx).reshape(Ht * Wt, hs * ws)
    return M.T                                                       # (hs*ws, Ht*Wt)


# ----------------------------------------------------------------------------
# Wrapper
# ----------------------------------------------------------------------------
def up_forward(x_l, x_r, p, *, mxu_dtype=jnp.bfloat16, images_per_step=None):
    """x_l: (N, in_ch//2, H, W), x_r: (N, in_ch//2, Hs, Ws). NCHW f32."""
    N, ch_half, H, W = x_l.shape
    _, _, hs, ws = x_r.shape
    HW = H * W
    cout = p["w1"].shape[-1]

    if images_per_step is None:
        # Fatter steps amortize per-step overhead (>=512 lanes if possible),
        # but keep >=2 grid steps when the batch allows so v7x's 2 TCs both
        # get work (on v5e/v6e a single fat step would also be fine).
        images_per_step = max(1, min(N, 512 // HW))
        while images_per_step > 1 and (N // images_per_step) < 2:
            images_per_step -= 1
    nb = max(1, images_per_step)
    while N % nb:
        nb -= 1

    upm = upsample_pad_matrix(hs, ws, H, W)                        # f32, exact
    w1 = pack_weight_taps(p["w1"], p["s1"], mxu_dtype)
    w2 = pack_weight_taps(p["w2"], p["s2"], mxu_dtype)

    call = _make_fused_up_double_conv(N, nb, ch_half, cout, H, W,
                                      hs * ws, mxu_dtype)
    out = call(x_l.reshape(N, ch_half, HW),
               x_r.reshape(N, ch_half, hs * ws),
               upm,
               w1, p["b1"].reshape(cout, 1),
               w2, p["b2"].reshape(cout, 1))
    return out.reshape(N, cout, H, W)


# ----------------------------------------------------------------------------
# Pure-JAX reference (gather-based upsample + XLA convs) for correctness
# ----------------------------------------------------------------------------
def bilinear_upsample_x2_align_corners(x):
    _, _, H, W = x.shape
    Ho, Wo = 2 * H, 2 * W

    def coords(out_size, in_size):
        src = (jnp.arange(out_size, dtype=jnp.float32)
               * (in_size - 1) / max(out_size - 1, 1))
        lo = jnp.clip(jnp.floor(src).astype(jnp.int32), 0, in_size - 1)
        hi = jnp.clip(lo + 1, 0, in_size - 1)
        return src - lo.astype(jnp.float32), lo, hi

    fy, y0, y1 = coords(Ho, H)
    fx, x0, x1 = coords(Wo, W)
    rows = (x[:, :, y0, :] * (1.0 - fy)[None, None, :, None]
            + x[:, :, y1, :] * fy[None, None, :, None])
    return (rows[:, :, :, x0] * (1.0 - fx)[None, None, None, :]
            + rows[:, :, :, x1] * fx[None, None, None, :])


def ref_conv_bn_relu(x, w_hwio, scale, bias):
    y = jax.lax.conv_general_dilated(
        x, w_hwio, window_strides=(1, 1), padding=((1, 1), (1, 1)),
        dimension_numbers=("NCHW", "HWIO", "NCHW"))
    return jnp.maximum(y * scale[None, :, None, None]
                       + bias[None, :, None, None], 0.0)


def ref_up_forward(x_l, x_r, p):
    x_r = bilinear_upsample_x2_align_corners(x_r)
    dh = x_l.shape[2] - x_r.shape[2]
    dw = x_l.shape[3] - x_r.shape[3]
    x_r = jnp.pad(x_r, ((0, 0), (0, 0),
                        (dh // 2, dh - dh // 2),
                        (dw // 2, dw - dw // 2)))
    x = jnp.concatenate([x_l, x_r], axis=1)
    x = ref_conv_bn_relu(x, p["w1"], p["s1"], p["b1"])
    x = ref_conv_bn_relu(x, p["w2"], p["s2"], p["b2"])
    return x


if __name__ == "__main__":
    key = jax.random.PRNGKey(0)
    in_ch, out_ch = 8, 4                 # up(in_ch=8, out_ch=4, bilinear=True)
    N, H, W = 2, 16, 16

    ks = jax.random.split(key, 14)
    x_l = jax.random.normal(ks[0], (N, in_ch // 2, H, W), jnp.float32)
    x_r = jax.random.normal(ks[1], (N, in_ch // 2, H // 2, W // 2), jnp.float32)

    w1 = jax.random.normal(ks[2], (3, 3, in_ch, out_ch), jnp.float32) * 0.1
    cb1 = jax.random.normal(ks[3], (out_ch,), jnp.float32) * 0.1
    g1 = 1.0 + 0.1 * jax.random.normal(ks[4], (out_ch,), jnp.float32)
    bt1 = 0.1 * jax.random.normal(ks[5], (out_ch,), jnp.float32)
    rm1 = 0.1 * jax.random.normal(ks[6], (out_ch,), jnp.float32)
    rv1 = 0.5 + jnp.abs(jax.random.normal(ks[7], (out_ch,), jnp.float32))

    w2 = jax.random.normal(ks[8], (3, 3, out_ch, out_ch), jnp.float32) * 0.1
    cb2 = jax.random.normal(ks[9], (out_ch,), jnp.float32) * 0.1
    g2 = 1.0 + 0.1 * jax.random.normal(ks[10], (out_ch,), jnp.float32)
    bt2 = 0.1 * jax.random.normal(ks[11], (out_ch,), jnp.float32)
    rm2 = jnp.zeros((out_ch,), jnp.float32)
    rv2 = jnp.ones((out_ch,), jnp.float32)

    s1, b1 = fold_bn(cb1, g1, bt1, rm1, rv1)
    s2, b2 = fold_bn(cb2, g2, bt2, rm2, rv2)
    params = {"w1": w1, "s1": s1, "b1": b1, "w2": w2, "s2": s2, "b2": b2}

    ref = jax.block_until_ready(ref_up_forward(x_l, x_r, params))

    # f32 MXU operands: strict check of the fused structure (incl. in-kernel
    # matmul-based upsample/pad and the halo-zero bookkeeping).
    out_f32 = jax.block_until_ready(
        up_forward(x_l, x_r, params, mxu_dtype=jnp.float32))
    assert out_f32.shape == (N, out_ch, H, W), out_f32.shape
    err_f32 = float(jnp.max(jnp.abs(out_f32 - ref)))
    assert jnp.allclose(out_f32, ref, atol=2e-3, rtol=2e-3), err_f32

    # bf16 MXU operands (default fast path): f32 accumulation, bf16 rounding
    # of activations/weights -> looser tolerance.
    out_bf16 = jax.block_until_ready(up_forward(x_l, x_r, params))
    err_bf16 = float(jnp.max(jnp.abs(out_bf16 - ref)))
    assert jnp.allclose(out_bf16, ref, atol=3e-2, rtol=3e-2), err_bf16

    # Lane-batched path: N=4 -> 2 images (512 lanes) per grid step, 2 steps.
    x_l4 = jax.random.normal(ks[12], (4, in_ch // 2, H, W), jnp.float32)
    x_r4 = jax.random.normal(ks[13], (4, in_ch // 2, H // 2, W // 2), jnp.float32)
    ref4 = jax.block_until_ready(ref_up_forward(x_l4, x_r4, params))
    out4 = jax.block_until_ready(
        up_forward(x_l4, x_r4, params, mxu_dtype=jnp.float32))
    err4 = float(jnp.max(jnp.abs(out4 - ref4)))
    assert jnp.allclose(out4, ref4, atol=2e-3, rtol=2e-3), err4

    print("KERNEL_OK")
</pallas_src>

<mosaic_0001>
module attributes {stable_mosaic.version = 11 : i64} {
  func.func @kernel(%arg0: i32, %arg1: memref<1x4x256xf32, #tpu.memory_space<vmem>>, %arg2: memref<1x4x64xf32, #tpu.memory_space<vmem>>, %arg3: memref<64x256xf32, #tpu.memory_space<vmem>>, %arg4: memref<9x4x8xf32, #tpu.memory_space<vmem>>, %arg5: memref<4x1xf32, #tpu.memory_space<vmem>>, %arg6: memref<9x4x4xf32, #tpu.memory_space<vmem>>, %arg7: memref<4x1xf32, #tpu.memory_space<vmem>>, %arg8: memref<1x4x256xf32, #tpu.memory_space<vmem>>, %arg9: memref<8x512xf32, #tpu.memory_space<vmem>>, %arg10: memref<4x512xf32, #tpu.memory_space<vmem>>) attributes {dimension_semantics = [#tpu.dimension_semantics<parallel>], iteration_bounds = array<i64: 2>, scalar_prefetch = 0 : i64, scratch_operands = 2 : i64, tpu.core_type = #tpu.core_type<tc>, window_params = [{transform_indices = @transform_0, window_bounds = array<i64: 1, 4, 256>}, {transform_indices = @transform_1, window_bounds = array<i64: 1, 4, 64>}, {pipeline_mode = #tpu.pipeline_mode<synchronous>, transform_indices = @transform_2, window_bounds = array<i64: 64, 256>}, {pipeline_mode = #tpu.pipeline_mode<synchronous>, transform_indices = @transform_3, window_bounds = array<i64: 9, 4, 8>}, {pipeline_mode = #tpu.pipeline_mode<synchronous>, transform_indices = @transform_4, window_bounds = array<i64: 4, 1>}, {pipeline_mode = #tpu.pipeline_mode<synchronous>, transform_indices = @transform_5, window_bounds = array<i64: 9, 4, 4>}, {pipeline_mode = #tpu.pipeline_mode<synchronous>, transform_indices = @transform_6, window_bounds = array<i64: 4, 1>}, {transform_indices = @transform_7, window_bounds = array<i64: 1, 4, 256>}]} {
    %cst = arith.constant 0.000000e+00 : f32
    %0 = vector.broadcast %cst : f32 to vector<8x128xf32>
    %c0 = arith.constant 0 : index
    %c0_0 = arith.constant 0 : index
    %1 = vector.load %arg9[%c0, %c0_0] : memref<8x512xf32, #tpu.memory_space<vmem>>, vector<8x128xf32>
    tpu.vector_store %arg9[%c0, %c0_0], %0 {strides = array<i32>} : memref<8x512xf32, #tpu.memory_space<vmem>>, vector<8x128xf32>,
    %cst_1 = arith.constant 0.000000e+00 : f32
    %2 = vector.broadcast %cst_1 : f32 to vector<4x128xf32>
    %c0_2 = arith.constant 0 : index
    %c0_3 = arith.constant 0 : index
    %3 = vector.load %arg10[%c0_2, %c0_3] : memref<4x512xf32, #tpu.memory_space<vmem>>, vector<4x128xf32>
    tpu.vector_store %arg10[%c0_2, %c0_3], %2 {strides = array<i32>} : memref<4x512xf32, #tpu.memory_space<vmem>>, vector<4x128xf32>,
    %cst_4 = arith.constant 0.000000e+00 : f32
    %4 = vector.broadcast %cst_4 : f32 to vector<8x128xf32>
    %c0_5 = arith.constant 0 : index
    %c384 = arith.constant 384 : index
    %5 = vector.load %arg9[%c0_5, %c384] : memref<8x512xf32, #tpu.memory_space<vmem>>, vector<8x128xf32>
    tpu.vector_store %arg9[%c0_5, %c384], %4 {strides = array<i32>} : memref<8x512xf32, #tpu.memory_space<vmem>>, vector<8x128xf32>,
    %cst_6 = arith.constant 0.000000e+00 : f32
    %6 = vector.broadcast %cst_6 : f32 to vector<4x128xf32>
    %c0_7 = arith.constant 0 : index
    %c384_8 = arith.constant 384 : index
    %7 = vector.load %arg10[%c0_7, %c384_8] : memref<4x512xf32, #tpu.memory_space<vmem>>, vector<4x128xf32>
    tpu.vector_store %arg10[%c0_7, %c384_8], %6 {strides = array<i32>} : memref<4x512xf32, #tpu.memory_space<vmem>>, vector<4x128xf32>,
    %c0_9 = arith.constant 0 : index
    %c0_10 = arith.constant 0 : index
    %c0_11 = arith.constant 0 : index
    %8 = vector.load %arg2[%c0_9, %c0_10, %c0_11] : memref<1x4x64xf32, #tpu.memory_space<vmem>>, vector<1x4x64xf32>
    %9 = vector.shape_cast %8 : vector<1x4x64xf32> to vector<4x64xf32>
    %c0_12 = arith.constant 0 : index
    %c0_13 = arith.constant 0 : index
    %10 = vector.load %arg3[%c0_12, %c0_13] : memref<64x256xf32, #tpu.memory_space<vmem>>, vector<64x256xf32>
    %cst_14 = arith.constant dense<0.000000e+00> : vector<4x256xf32>
    %11 = tpu.matmul %9, %10, %cst_14 {dimension_numbers = #tpu.dot_dimension_numbers<[1], [0], [0], [1], [0, 0, 1, 1], [], []>} : vector<4x64xf32>, vector<64x256xf32>, vector<4x256xf32> -> vector<4x256xf32>
    %c0_15 = arith.constant 0 : index
    %c0_16 = arith.constant 0 : index
    %c0_17 = arith.constant 0 : index
    %12 = vector.load %arg1[%c0_15, %c0_16, %c0_17] : memref<1x4x256xf32, #tpu.memory_space<vmem>>, vector<1x4x256xf32>
    %13 = vector.shape_cast %12 : vector<1x4x256xf32> to vector<4x256xf32>
    %c0_18 = arith.constant 0 : index
    %c128 = arith.constant 128 : index
    %14 = vector.load %arg9[%c0_18, %c128] : memref<8x512xf32, #tpu.memory_space<vmem>>, vector<4x256xf32>
    tpu.vector_store %arg9[%c0_18, %c128], %13 {strides = array<i32>} : memref<8x512xf32, #tpu.memory_space<vmem>>, vector<4x256xf32>,
    %c4 = arith.constant 4 : index
    %c128_19 = arith.constant 128 : index
    %15 = vector.load %arg9[%c4, %c128_19] : memref<8x512xf32, #tpu.memory_space<vmem>>, vector<4x256xf32>
    tpu.vector_store %arg9[%c4, %c128_19], %11 {strides = array<i32>} : memref<8x512xf32, #tpu.memory_space<vmem>>, vector<4x256xf32>,
    %16 = tpu.iota {dimensions = array<i32: 1>} : vector<1x256xi32>
    %c384_i32 = arith.constant 384 : i32
    %c0_i32 = arith.constant 0 : i32
    %17 = arith.cmpi eq, %c384_i32, %c0_i32 : i32
    %c1_i32 = arith.constant 1 : i32
    %18 = arith.select %17, %c1_i32, %c384_i32 : i32
    %19 = vector.broadcast %18 : i32 to vector<1x256xi32>
    %20 = arith.remsi %16, %19 : vector<1x256xi32>
    %c0_i32_20 = arith.constant 0 : i32
    %21 = vector.broadcast %c0_i32_20 : i32 to vector<1x256xi32>
    %22 = arith.cmpi ne, %20, %21 : vector<1x256xi32>
    %c0_i32_21 = arith.constant 0 : i32
    %23 = vector.broadcast %c0_i32_21 : i32 to vector<1x256xi32>
    %24 = arith.cmpi slt, %20, %23 : vector<1x256xi32>
    %c0_i32_22 = arith.constant 0 : i32
    %25 = arith.cmpi slt, %18, %c0_i32_22 : i32
    %26 = vector.broadcast %25 : i1 to vector<1x256xi1>
    %27 = vector.broadcast %26 : vector<1x256xi1> to vector<1x256xi1>
    %28 = arith.xori %24, %27 : vector<1x256xi1>
    %29 = arith.andi %28, %22 : vector<1x256xi1>
    %30 = vector.broadcast %18 : i32 to vector<1x256xi32>
    %31 = arith.addi %20, %30 : vector<1x256xi32>
    %32 = arith.select %29, %31, %20 : vector<1x256xi1>, vector<1x256xi32>
    %c16_i32 = arith.constant 16 : i32
    %c0_i32_23 = arith.constant 0 : i32
    %33 = arith.cmpi eq, %c16_i32, %c0_i32_23 : i32
    %c1_i32_24 = arith.constant 1 : i32
    %34 = arith.select %33, %c1_i32_24, %c16_i32 : i32
    %35 = vector.broadcast %34 : i32 to vector<1x256xi32>
    %36 = arith.remsi %32, %35 : vector<1x256xi32>
    %c0_i32_25 = arith.constant 0 : i32
    %37 = vector.broadcast %c0_i32_25 : i32 to vector<1x256xi32>
    %38 = arith.cmpi ne, %36, %37 : vector<1x256xi32>
    %c0_i32_26 = arith.constant 0 : i32
    %39 = vector.broadcast %c0_i32_26 : i32 to vector<1x256xi32>
    %40 = arith.cmpi slt, %36, %39 : vector<1x256xi32>
    %c0_i32_27 = arith.constant 0 : i32
    %41 = arith.cmpi slt, %34, %c0_i32_27 : i32
    %42 = vector.broadcast %41 : i1 to vector<1x256xi1>
    %43 = vector.broadcast %42 : vector<1x256xi1> to vector<1x256xi1>
    %44 = arith.xori %40, %43 : vector<1x256xi1>
    %45 = arith.andi %44, %38 : vector<1x256xi1>
    %46 = vector.broadcast %34 : i32 to vector<1x256xi32>
    %47 = arith.addi %36, %46 : vector<1x256xi32>
    %48 = arith.select %45, %47, %36 : vector<1x256xi1>, vector<1x256xi32>
    %c0_i32_28 = arith.constant 0 : i32
    %49 = vector.broadcast %c0_i32_28 : i32 to vector<1x256xi32>
    %50 = arith.cmpi ne, %48, %49 : vector<1x256xi32>
    %51 = arith.extui %50 : vector<1x256xi1> to vector<1x256xi32>
    %52 = arith.sitofp %51 : vector<1x256xi32> to vector<1x256xf32>
    %c15_i32 = arith.constant 15 : i32
    %53 = vector.broadcast %c15_i32 : i32 to vector<1x256xi32>
    %54 = arith.cmpi ne, %48, %53 : vector<1x256xi32>
    %55 = arith.extui %54 : vector<1x256xi1> to vector<1x256xi32>
    %56 = arith.sitofp %55 : vector<1x256xi32> to vector<1x256xf32>
    %cst_29 = arith.constant 0.000000e+00 : f32
    %57 = vector.broadcast %cst_29 : f32 to vector<4x256xf32>
    %c0_30 = arith.constant 0 : index
    %c111 = arith.constant 111 : index
    %58 = vector.load %arg9[%c0_30, %c111] : memref<8x512xf32, #tpu.memory_space<vmem>>, vector<8x256xf32>
    %c0_31 = arith.constant 0 : index
    %c0_32 = arith.constant 0 : index
    %c0_33 = arith.constant 0 : index
    %59 = vector.load %arg4[%c0_31, %c0_32, %c0_33] : memref<9x4x8xf32, #tpu.memory_space<vmem>>, vector<1x4x8xf32>
    %60 = vector.shape_cast %59 : vector<1x4x8xf32> to vector<4x8xf32>
    %cst_34 = arith.constant dense<0.000000e+00> : vector<4x256xf32>
    %61 = tpu.matmul %60, %58, %cst_34 {dimension_numbers = #tpu.dot_dimension_numbers<[1], [0], [0], [1], [0, 0, 1, 1], [], []>} : vector<4x8xf32>, vector<8x256xf32>, vector<4x256xf32> -> vector<4x256xf32>
    %62 = vector.broadcast %52 : vector<1x256xf32> to vector<4x256xf32>
    %63 = arith.mulf %61, %62 : vector<4x256xf32>
    %64 = arith.addf %57, %63 : vector<4x256xf32>
    %c0_35 = arith.constant 0 : index
    %c112 = arith.constant 112 : index
    %65 = vector.load %arg9[%c0_35, %c112] : memref<8x512xf32, #tpu.memory_space<vmem>>, vector<8x256xf32>
    %c1 = arith.constant 1 : index
    %c0_36 = arith.constant 0 : index
    %c0_37 = arith.constant 0 : index
    %66 = vector.load %arg4[%c1, %c0_36, %c0_37] : memref<9x4x8xf32, #tpu.memory_space<vmem>>, vector<1x4x8xf32>
    %67 = vector.shape_cast %66 : vector<1x4x8xf32> to vector<4x8xf32>
    %cst_38 = arith.constant dense<0.000000e+00> : vector<4x256xf32>
    %68 = tpu.matmul %67, %65, %cst_38 {dimension_numbers = #tpu.dot_dimension_numbers<[1], [0], [0], [1], [0, 0, 1, 1], [], []>} : vector<4x8xf32>, vector<8x256xf32>, vector<4x256xf32> -> vector<4x256xf32>
    %69 = arith.addf %64, %68 : vector<4x256xf32>
    %c0_39 = arith.constant 0 : index
    %c113 = arith.constant 113 : index
    %70 = vector.load %arg9[%c0_39, %c113] : memref<8x512xf32, #tpu.memory_space<vmem>>, vector<8x256xf32>
    %c2 = arith.constant 2 : index
    %c0_40 = arith.constant 0 : index
    %c0_41 = arith.constant 0 : index
    %71 = vector.load %arg4[%c2, %c0_40, %c0_41] : memref<9x4x8xf32, #tpu.memory_space<vmem>>, vector<1x4x8xf32>
    %72 = vector.shape_cast %71 : vector<1x4x8xf32> to vector<4x8xf32>
    %cst_42 = arith.constant dense<0.000000e+00> : vector<4x256xf32>
    %73 = tpu.matmul %72, %70, %cst_42 {dimension_numbers = #tpu.dot_dimension_numbers<[1], [0], [0], [1], [0, 0, 1, 1], [], []>} : vector<4x8xf32>, vector<8x256xf32>, vector<4x256xf32> -> vector<4x256xf32>
    %74 = vector.broadcast %56 : vector<1x256xf32> to vector<4x256xf32>
    %75 = arith.mulf %73, %74 : vector<4x256xf32>
    %76 = arith.addf %69, %75 : vector<4x256xf32>
    %c0_43 = arith.constant 0 : index
    %c127 = arith.constant 127 : index
    %77 = vector.load %arg9[%c0_43, %c127] : memref<8x512xf32, #tpu.memory_space<vmem>>, vector<8x256xf32>
    %c3 = arith.constant 3 : index
    %c0_44 = arith.constant 0 : index
    %c0_45 = arith.constant 0 : index
    %78 = vector.load %arg4[%c3, %c0_44, %c0_45] : memref<9x4x8xf32, #tpu.memory_space<vmem>>, vector<1x4x8xf32>
    %79 = vector.shape_cast %78 : vector<1x4x8xf32> to vector<4x8xf32>
    %cst_46 = arith.constant dense<0.000000e+00> : vector<4x256xf32>
    %80 = tpu.matmul %79, %77, %cst_46 {dimension_numbers = #tpu.dot_dimension_numbers<[1], [0], [0], [1], [0, 0, 1, 1], [], []>} : vector<4x8xf32>, vector<8x256xf32>, vector<4x256xf32> -> vector<4x256xf32>
    %81 = vector.broadcast %52 : vector<1x256xf32> to vector<4x256xf32>
    %82 = arith.mulf %80, %81 : vector<4x256xf32>
    %83 = arith.addf %76, %82 : vector<4x256xf32>
    %c0_47 = arith.constant 0 : index
    %c128_48 = arith.constant 128 : index
    %84 = vector.load %arg9[%c0_47, %c128_48] : memref<8x512xf32, #tpu.memory_space<vmem>>, vector<8x256xf32>
    %c4_49 = arith.constant 4 : index
    %c0_50 = arith.constant 0 : index
    %c0_51 = arith.constant 0 : index
    %85 = vector.load %arg4[%c4_49, %c0_50, %c0_51] : memref<9x4x8xf32, #tpu.memory_space<vmem>>, vector<1x4x8xf32>
    %86 = vector.shape_cast %85 : vector<1x4x8xf32> to vector<4x8xf32>
    %cst_52 = arith.constant dense<0.000000e+00> : vector<4x256xf32>
    %87 = tpu.matmul %86, %84, %cst_52 {dimension_numbers = #tpu.dot_dimension_numbers<[1], [0], [0], [1], [0, 0, 1, 1], [], []>} : vector<4x8xf32>, vector<8x256xf32>, vector<4x256xf32> -> vector<4x256xf32>
    %88 = arith.addf %83, %87 : vector<4x256xf32>
    %c0_53 = arith.constant 0 : index
    %c129 = arith.constant 129 : index
    %89 = vector.load %arg9[%c0_53, %c129] : memref<8x512xf32, #tpu.memory_space<vmem>>, vector<8x256xf32>
    %c5 = arith.constant 5 : index
    %c0_54 = arith.constant 0 : index
    %c0_55 = arith.constant 0 : index
    %90 = vector.load %arg4[%c5, %c0_54, %c0_55] : memref<9x4x8xf32, #tpu.memory_space<vmem>>, vector<1x4x8xf32>
    %91 = vector.shape_cast %90 : vector<1x4x8xf32> to vector<4x8xf32>
    %cst_56 = arith.constant dense<0.000000e+00> : vector<4x256xf32>
    %92 = tpu.matmul %91, %89, %cst_56 {dimension_numbers = #tpu.dot_dimension_numbers<[1], [0], [0], [1], [0, 0, 1, 1], [], []>} : vector<4x8xf32>, vector<8x256xf32>, vector<4x256xf32> -> vector<4x256xf32>
    %93 = vector.broadcast %56 : vector<1x256xf32> to vector<4x256xf32>
    %94 = arith.mulf %92, %93 : vector<4x256xf32>
    %95 = arith.addf %88, %94 : vector<4x256xf32>
    %c0_57 = arith.constant 0 : index
    %c143 = arith.constant 143 : index
    %96 = vector.load %arg9[%c0_57, %c143] : memref<8x512xf32, #tpu.memory_space<vmem>>, vector<8x256xf32>
    %c6 = arith.constant 6 : index
    %c0_58 = arith.constant 0 : index
    %c0_59 = arith.constant 0 : index
    %97 = vector.load %arg4[%c6, %c0_58, %c0_59] : memref<9x4x8xf32, #tpu.memory_space<vmem>>, vector<1x4x8xf32>
    %98 = vector.shape_cast %97 : vector<1x4x8xf32> to vector<4x8xf32>
    %cst_60 = arith.constant dense<0.000000e+00> : vector<4x256xf32>
    %99 = tpu.matmul %98, %96, %cst_60 {dimension_numbers = #tpu.dot_dimension_numbers<[1], [0], [0], [1], [0, 0, 1, 1], [], []>} : vector<4x8xf32>, vector<8x256xf32>, vector<4x256xf32> -> vector<4x256xf32>
    %100 = vector.broadcast %52 : vector<1x256xf32> to vector<4x256xf32>
    %101 = arith.mulf %99, %100 : vector<4x256xf32>
    %102 = arith.addf %95, %101 : vector<4x256xf32>
    %c0_61 = arith.constant 0 : index
    %c144 = arith.constant 144 : index
    %103 = vector.load %arg9[%c0_61, %c144] : memref<8x512xf32, #tpu.memory_space<vmem>>, vector<8x256xf32>
    %c7 = arith.constant 7 : index
    %c0_62 = arith.constant 0 : index
    %c0_63 = arith.constant 0 : index
    %104 = vector.load %arg4[%c7, %c0_62, %c0_63] : memref<9x4x8xf32, #tpu.memory_space<vmem>>, vector<1x4x8xf32>
    %105 = vector.shape_cast %104 : vector<1x4x8xf32> to vector<4x8xf32>
    %cst_64 = arith.constant dense<0.000000e+00> : vector<4x256xf32>
    %106 = tpu.matmul %105, %103, %cst_64 {dimension_numbers = #tpu.dot_dimension_numbers<[1], [0], [0], [1], [0, 0, 1, 1], [], []>} : vector<4x8xf32>, vector<8x256xf32>, vector<4x256xf32> -> vector<4x256xf32>
    %107 = arith.addf %102, %106 : vector<4x256xf32>
    %c0_65 = arith.constant 0 : index
    %c145 = arith.constant 145 : index
    %108 = vector.load %arg9[%c0_65, %c145] : memref<8x512xf32, #tpu.memory_space<vmem>>, vector<8x256xf32>
    %c8 = arith.constant 8 : index
    %c0_66 = arith.constant 0 : index
    %c0_67 = arith.constant 0 : index
    %109 = vector.load %arg4[%c8, %c0_66, %c0_67] : memref<9x4x8xf32, #tpu.memory_space<vmem>>, vector<1x4x8xf32>
    %110 = vector.shape_cast %109 : vector<1x4x8xf32> to vector<4x8xf32>
    %cst_68 = arith.constant dense<0.000000e+00> : vector<4x256xf32>
    %111 = tpu.matmul %110, %108, %cst_68 {dimension_numbers = #tpu.dot_dimension_numbers<[1], [0], [0], [1], [0, 0, 1, 1], [], []>} : vector<4x8xf32>, vector<8x256xf32>, vector<4x256xf32> -> vector<4x256xf32>
    %112 = vector.broadcast %56 : vector<1x256xf32> to vector<4x256xf32>
    %113 = arith.mulf %111, %112 : vector<4x256xf32>
    %114 = arith.addf %107, %113 : vector<4x256xf32>
    %c0_69 = arith.constant 0 : index
    %c0_70 = arith.constant 0 : index
    %115 = vector.load %arg5[%c0_69, %c0_70] : memref<4x1xf32, #tpu.memory_space<vmem>>, vector<4x1xf32>
    %116 = vector.broadcast %115 : vector<4x1xf32> to vector<4x256xf32>
    %117 = arith.addf %114, %116 : vector<4x256xf32>
    %cst_71 = arith.constant 0.000000e+00 : f32
    %118 = vector.broadcast %cst_71 : f32 to vector<4x256xf32>
    %119 = arith.maximumf %117, %118 : vector<4x256xf32>
    %c0_72 = arith.constant 0 : index
    %c128_73 = arith.constant 128 : index
    %120 = vector.load %arg10[%c0_72, %c128_73] : memref<4x512xf32, #tpu.memory_space<vmem>>, vector<4x256xf32>
    tpu.vector_store %arg10[%c0_72, %c128_73], %119 {strides = array<i32>} : memref<4x512xf32, #tpu.memory_space<vmem>>, vector<4x256xf32>,
    %cst_74 = arith.constant 0.000000e+00 : f32
    %121 = vector.broadcast %cst_74 : f32 to vector<4x256xf32>
    %c0_75 = arith.constant 0 : index
    %c111_76 = arith.constant 111 : index
    %122 = vector.load %arg10[%c0_75, %c111_76] : memref<4x512xf32, #tpu.memory_space<vmem>>, vector<4x256xf32>
    %c0_77 = arith.constant 0 : index
    %c0_78 = arith.constant 0 : index
    %c0_79 = arith.constant 0 : index
    %123 = vector.load %arg6[%c0_77, %c0_78, %c0_79] : memref<9x4x4xf32, #tpu.memory_space<vmem>>, vector<1x4x4xf32>
    %124 = vector.shape_cast %123 : vector<1x4x4xf32> to vector<4x4xf32>
    %cst_80 = arith.constant dense<0.000000e+00> : vector<4x256xf32>
    %125 = tpu.matmul %124, %122, %cst_80 {dimension_numbers = #tpu.dot_dimension_numbers<[1], [0], [0], [1], [0, 0, 1, 1], [], []>} : vector<4x4xf32>, vector<4x256xf32>, vector<4x256xf32> -> vector<4x256xf32>
    %126 = vector.broadcast %52 : vector<1x256xf32> to vector<4x256xf32>
    %127 = arith.mulf %125, %126 : vector<4x256xf32>
    %128 = arith.addf %121, %127 : vector<4x256xf32>
    %c0_81 = arith.constant 0 : index
    %c112_82 = arith.constant 112 : index
    %129 = vector.load %arg10[%c0_81, %c112_82] : memref<4x512xf32, #tpu.memory_space<vmem>>, vector<4x256xf32>
    %c1_83 = arith.constant 1 : index
    %c0_84 = arith.constant 0 : index
    %c0_85 = arith.constant 0 : index
    %130 = vector.load %arg6[%c1_83, %c0_84, %c0_85] : memref<9x4x4xf32, #tpu.memory_space<vmem>>, vector<1x4x4xf32>
    %131 = vector.shape_cast %130 : vector<1x4x4xf32> to vector<4x4xf32>
    %cst_86 = arith.constant dense<0.000000e+00> : vector<4x256xf32>
    %132 = tpu.matmul %131, %129, %cst_86 {dimension_numbers = #tpu.dot_dimension_numbers<[1], [0], [0], [1], [0, 0, 1, 1], [], []>} : vector<4x4xf32>, vector<4x256xf32>, vector<4x256xf32> -> vector<4x256xf32>
    %133 = arith.addf %128, %132 : vector<4x256xf32>
    %c0_87 = arith.constant 0 : index
    %c113_88 = arith.constant 113 : index
    %134 = vector.load %arg10[%c0_87, %c113_88] : memref<4x512xf32, #tpu.memory_space<vmem>>, vector<4x256xf32>
    %c2_89 = arith.constant 2 : index
    %c0_90 = arith.constant 0 : index
    %c0_91 = arith.constant 0 : index
    %135 = vector.load %arg6[%c2_89, %c0_90, %c0_91] : memref<9x4x4xf32, #tpu.memory_space<vmem>>, vector<1x4x4xf32>
    %136 = vector.shape_cast %135 : vector<1x4x4xf32> to vector<4x4xf32>
    %cst_92 = arith.constant dense<0.000000e+00> : vector<4x256xf32>
    %137 = tpu.matmul %136, %134, %cst_92 {dimension_numbers = #tpu.dot_dimension_numbers<[1], [0], [0], [1], [0, 0, 1, 1], [], []>} : vector<4x4xf32>, vector<4x256xf32>, vector<4x256xf32> -> vector<4x256xf32>
    %138 = vector.broadcast %56 : vector<1x256xf32> to vector<4x256xf32>
    %139 = arith.mulf %137, %138 : vector<4x256xf32>
    %140 = arith.addf %133, %139 : vector<4x256xf32>
    %c0_93 = arith.constant 0 : index
    %c127_94 = arith.constant 127 : index
    %141 = vector.load %arg10[%c0_93, %c127_94] : memref<4x512xf32, #tpu.memory_space<vmem>>, vector<4x256xf32>
    %c3_95 = arith.constant 3 : index
    %c0_96 = arith.constant 0 : index
    %c0_97 = arith.constant 0 : index
    %142 = vector.load %arg6[%c3_95, %c0_96, %c0_97] : memref<9x4x4xf32, #tpu.memory_space<vmem>>, vector<1x4x4xf32>
    %143 = vector.shape_cast %142 : vector<1x4x4xf32> to vector<4x4xf32>
    %cst_98 = arith.constant dense<0.000000e+00> : vector<4x256xf32>
    %144 = tpu.matmul %143, %141, %cst_98 {dimension_numbers = #tpu.dot_dimension_numbers<[1], [0], [0], [1], [0, 0, 1, 1], [], []>} : vector<4x4xf32>, vector<4x256xf32>, vector<4x256xf32> -> vector<4x256xf32>
    %145 = vector.broadcast %52 : vector<1x256xf32> to vector<4x256xf32>
    %146 = arith.mulf %144, %145 : vector<4x256xf32>
    %147 = arith.addf %140, %146 : vector<4x256xf32>
    %c0_99 = arith.constant 0 : index
    %c128_100 = arith.constant 128 : index
    %148 = vector.load %arg10[%c0_99, %c128_100] : memref<4x512xf32, #tpu.memory_space<vmem>>, vector<4x256xf32>
    %c4_101 = arith.constant 4 : index
    %c0_102 = arith.constant 0 : index
    %c0_103 = arith.constant 0 : index
    %149 = vector.load %arg6[%c4_101, %c0_102, %c0_103] : memref<9x4x4xf32, #tpu.memory_space<vmem>>, vector<1x4x4xf32>
    %150 = vector.shape_cast %149 : vector<1x4x4xf32> to vector<4x4xf32>
    %cst_104 = arith.constant dense<0.000000e+00> : vector<4x256xf32>
    %151 = tpu.matmul %150, %148, %cst_104 {dimension_numbers = #tpu.dot_dimension_numbers<[1], [0], [0], [1], [0, 0, 1, 1], [], []>} : vector<4x4xf32>, vector<4x256xf32>, vector<4x256xf32> -> vector<4x256xf32>
    %152 = arith.addf %147, %151 : vector<4x256xf32>
    %c0_105 = arith.constant 0 : index
    %c129_106 = arith.constant 129 : index
    %153 = vector.load %arg10[%c0_105, %c129_106] : memref<4x512xf32, #tpu.memory_space<vmem>>, vector<4x256xf32>
    %c5_107 = arith.constant 5 : index
    %c0_108 = arith.constant 0 : index
    %c0_109 = arith.constant 0 : index
    %154 = vector.load %arg6[%c5_107, %c0_108, %c0_109] : memref<9x4x4xf32, #tpu.memory_space<vmem>>, vector<1x4x4xf32>
    %155 = vector.shape_cast %154 : vector<1x4x4xf32> to vector<4x4xf32>
    %cst_110 = arith.constant dense<0.000000e+00> : vector<4x256xf32>
    %156 = tpu.matmul %155, %153, %cst_110 {dimension_numbers = #tpu.dot_dimension_numbers<[1], [0], [0], [1], [0, 0, 1, 1], [], []>} : vector<4x4xf32>, vector<4x256xf32>, vector<4x256xf32> -> vector<4x256xf32>
    %157 = vector.broadcast %56 : vector<1x256xf32> to vector<4x256xf32>
    %158 = arith.mulf %156, %157 : vector<4x256xf32>
    %159 = arith.addf %152, %158 : vector<4x256xf32>
    %c0_111 = arith.constant 0 : index
    %c143_112 = arith.constant 143 : index
    %160 = vector.load %arg10[%c0_111, %c143_112] : memref<4x512xf32, #tpu.memory_space<vmem>>, vector<4x256xf32>
    %c6_113 = arith.constant 6 : index
    %c0_114 = arith.constant 0 : index
    %c0_115 = arith.constant 0 : index
    %161 = vector.load %arg6[%c6_113, %c0_114, %c0_115] : memref<9x4x4xf32, #tpu.memory_space<vmem>>, vector<1x4x4xf32>
    %162 = vector.shape_cast %161 : vector<1x4x4xf32> to vector<4x4xf32>
    %cst_116 = arith.constant dense<0.000000e+00> : vector<4x256xf32>
    %163 = tpu.matmul %162, %160, %cst_116 {dimension_numbers = #tpu.dot_dimension_numbers<[1], [0], [0], [1], [0, 0, 1, 1], [], []>} : vector<4x4xf32>, vector<4x256xf32>, vector<4x256xf32> -> vector<4x256xf32>
    %164 = vector.broadcast %52 : vector<1x256xf32> to vector<4x256xf32>
    %165 = arith.mulf %163, %164 : vector<4x256xf32>
    %166 = arith.addf %159, %165 : vector<4x256xf32>
    %c0_117 = arith.constant 0 : index
    %c144_118 = arith.constant 144 : index
    %167 = vector.load %arg10[%c0_117, %c144_118] : memref<4x512xf32, #tpu.memory_space<vmem>>, vector<4x256xf32>
    %c7_119 = arith.constant 7 : index
    %c0_120 = arith.constant 0 : index
    %c0_121 = arith.constant 0 : index
    %168 = vector.load %arg6[%c7_119, %c0_120, %c0_121] : memref<9x4x4xf32, #tpu.memory_space<vmem>>, vector<1x4x4xf32>
    %169 = vector.shape_cast %168 : vector<1x4x4xf32> to vector<4x4xf32>
    %cst_122 = arith.constant dense<0.000000e+00> : vector<4x256xf32>
    %170 = tpu.matmul %169, %167, %cst_122 {dimension_numbers = #tpu.dot_dimension_numbers<[1], [0], [0], [1], [0, 0, 1, 1], [], []>} : vector<4x4xf32>, vector<4x256xf32>, vector<4x256xf32> -> vector<4x256xf32>
    %171 = arith.addf %166, %170 : vector<4x256xf32>
    %c0_123 = arith.constant 0 : index
    %c145_124 = arith.constant 145 : index
    %172 = vector.load %arg10[%c0_123, %c145_124] : memref<4x512xf32, #tpu.memory_space<vmem>>, vector<4x256xf32>
    %c8_125 = arith.constant 8 : index
    %c0_126 = arith.constant 0 : index
    %c0_127 = arith.constant 0 : index
    %173 = vector.load %arg6[%c8_125, %c0_126, %c0_127] : memref<9x4x4xf32, #tpu.memory_space<vmem>>, vector<1x4x4xf32>
    %174 = vector.shape_cast %173 : vector<1x4x4xf32> to vector<4x4xf32>
    %cst_128 = arith.constant dense<0.000000e+00> : vector<4x256xf32>
    %175 = tpu.matmul %174, %172, %cst_128 {dimension_numbers = #tpu.dot_dimension_numbers<[1], [0], [0], [1], [0, 0, 1, 1], [], []>} : vector<4x4xf32>, vector<4x256xf32>, vector<4x256xf32> -> vector<4x256xf32>
    %176 = vector.broadcast %56 : vector<1x256xf32> to vector<4x256xf32>
    %177 = arith.mulf %175, %176 : vector<4x256xf32>
    %178 = arith.addf %171, %177 : vector<4x256xf32>
    %c0_129 = arith.constant 0 : index
    %c0_130 = arith.constant 0 : index
    %179 = vector.load %arg7[%c0_129, %c0_130] : memref<4x1xf32, #tpu.memory_space<vmem>>, vector<4x1xf32>
    %180 = vector.broadcast %179 : vector<4x1xf32> to vector<4x256xf32>
    %181 = arith.addf %178, %180 : vector<4x256xf32>
    %cst_131 = arith.constant 0.000000e+00 : f32
    %182 = vector.broadcast %cst_131 : f32 to vector<4x256xf32>
    %183 = arith.maximumf %181, %182 : vector<4x256xf32>
    %c0_132 = arith.constant 0 : index
    %c0_133 = arith.constant 0 : index
    %c0_134 = arith.constant 0 : index
    %184 = vector.load %arg8[%c0_132, %c0_133, %c0_134] : memref<1x4x256xf32, #tpu.memory_space<vmem>>, vector<1x4x256xf32>
    %185 = vector.shape_cast %184 : vector<1x4x256xf32> to vector<4x256xf32>
    %186 = vector.shape_cast %183 : vector<4x256xf32> to vector<1x4x256xf32>
    tpu.vector_store %arg8[%c0_132, %c0_133, %c0_134], %186 {strides = array<i32>} : memref<1x4x256xf32, #tpu.memory_space<vmem>>, vector<1x4x256xf32>,
    return
  }
  func.func @transform_0(%arg0: i32) -> (i32, i32, i32) {
    %c0_i32 = arith.constant 0 : i32
    %c0_i32_0 = arith.constant 0 : i32
    %c0_i32_1 = arith.constant 0 : i32
    return %arg0, %c0_i32, %c0_i32_0 : i32, i32, i32
  }
  func.func @transform_1(%arg0: i32) -> (i32, i32, i32) {
    %c0_i32 = arith.constant 0 : i32
    %c0_i32_0 = arith.constant 0 : i32
    %c0_i32_1 = arith.constant 0 : i32
    return %arg0, %c0_i32, %c0_i32_0 : i32, i32, i32
  }
  func.func @transform_2(%arg0: i32) -> (i32, i32) {
    %c0_i32 = arith.constant 0 : i32
    %c0_i32_0 = arith.constant 0 : i32
    %c0_i32_1 = arith.constant 0 : i32
    return %c0_i32, %c0_i32_0 : i32, i32
  }
  func.func @transform_3(%arg0: i32) -> (i32, i32, i32) {
    %c0_i32 = arith.constant 0 : i32
    %c0_i32_0 = arith.constant 0 : i32
    %c0_i32_1 = arith.constant 0 : i32
    %c0_i32_2 = arith.constant 0 : i32
    return %c0_i32, %c0_i32_0, %c0_i32_1 : i32, i32, i32
  }
  func.func @transform_4(%arg0: i32) -> (i32, i32) {
    %c0_i32 = arith.constant 0 : i32
    %c0_i32_0 = arith.constant 0 : i32
    %c0_i32_1 = arith.constant 0 : i32
    return %c0_i32, %c0_i32_0 : i32, i32
  }
  func.func @transform_5(%arg0: i32) -> (i32, i32, i32) {
    %c0_i32 = arith.constant 0 : i32
    %c0_i32_0 = arith.constant 0 : i32
    %c0_i32_1 = arith.constant 0 : i32
    %c0_i32_2 = arith.constant 0 : i32
    return %c0_i32, %c0_i32_0, %c0_i32_1 : i32, i32, i32
  }
  func.func @transform_6(%arg0: i32) -> (i32, i32) {
    %c0_i32 = arith.constant 0 : i32
    %c0_i32_0 = arith.constant 0 : i32
    %c0_i32_1 = arith.constant 0 : i32
    return %c0_i32, %c0_i32_0 : i32, i32
  }
  func.func @transform_7(%arg0: i32) -> (i32, i32, i32) {
    %c0_i32 = arith.constant 0 : i32
    %c0_i32_0 = arith.constant 0 : i32
    %c0_i32_1 = arith.constant 0 : i32
    return %arg0, %c0_i32, %c0_i32_0 : i32, i32, i32
  }
}

</mosaic_0001>

<bundles_post_ra>
// kernel: tpu_custom_call.1
= control target key start
LH: loop header
LB: loop body
LE: loop exit
PB: predicated region body
PF: predicated region fallthrough
CT: control target
= control target key end

     0   :  { %s3243_s0 = inlined_call_operand.hbm [shape: f32[2,4,256], index: 0, kind: input, shape index: {}]   ;;  %s3244_s1 = inlined_call_operand.hbm [shape: f32[2,4,64], index: 1, kind: input, shape index: {}]   ;;  %s3245_s2 = inlined_call_operand.vmem [shape: f32[64,256], index: 2, kind: input, shape index: {}]   ;;  %s3246_s3 = inlined_call_operand.vmem [shape: f32[9,4,8], index: 3, kind: input, shape index: {}]   ;;  %s3247_s4 = inlined_call_operand.vmem [shape: f32[4,1], index: 4, kind: input, shape index: {}]   ;;  %s3248_s5 = inlined_call_operand.vmem [shape: f32[9,4,4], index: 5, kind: input, shape index: {}]   ;;  %s3249_s6 = inlined_call_operand.vmem [shape: f32[4,1], index: 6, kind: input, shape index: {}]   ;;  %s3250_s7 = inlined_call_operand.hbm [shape: f32[2,4,256], index: 7, kind: output, shape index: {}]  }
   0x1   :  { %3260 = sst [smem:[#allocation13_spill]] %s3243_s0 }
   0x2   :  { %12 = vsyncpa [#allocation5], 0 }
   0x3   :  { %14 = vsyncpa [#allocation5 + $0x1], 0 }
   0x4   :  { %15 = vsyncpa [#allocation8], 0 }
   0x5   :  { %17 = vsyncpa [#allocation8 + $0x1], 0 }
   0x6   :  { %18 = vsyncpa [#allocation6], 0 }
   0x7   :  { %20 = vsyncpa [#allocation6 + $0x1], 0  ;;  %s2699_s24 = smov 0   ;;  %s2701_s25 = smov 0  }
   0x8   :  { %s2703_s26 = smov 0   ;;  %s2705_s27 = smov 0  }
   0x9 LB: > { %s2720_s28 = sadd.s32 4294967295, %s2644_s27   ;;  %s2323_s29 = sadd.s32 4294967294, %s2644_s27   ;;  %s2644_s27 = sphi %s2705_s27, %s3288_s27   ;;  %s2640_s26 = sphi %s2703_s26, %s3287_s26   ;;  %s2636_s25 = sphi %s2701_s25, %s3286_s25   ;;  %s2632_s24 = sphi %s2699_s24, %s3285_s24  }
   0xa   : > { %s2724_s30 = sadd.s32 1, %s2644_s27   ;;  %s33_s8 = sadd.s32 1, %s2640_s26 }
   0xb   : > { %s30_s9 = ssub.s32 %s2644_s27, %s2724_s30  ;;  %p40_p0 = scmp.ne.s32.totalorder %s2640_s26, %s2636_s25 }
   0xc   : > { %p31_p1 = scmp.eq.s32.totalorder %s30_s9, 0  ;;  %p41_p2 = scmp.eq.s32.totalorder %s2644_s27, 0 }
   0xd   : > { %p46_p3 = scmp.ne.s32.totalorder %s2636_s25, %s2632_s24  ;;  %p47_p4 = scmp.eq.s32.totalorder %s2720_s28, 0 }
   0xe   : > { %s2736_s10 = scalar_select %p31_p1, %s2640_s26, %s33_s8  }
   0xf   : > { %p2738_p5 = por %p41_p2, %p40_p0  ;;  %p2742_p6 = por %p47_p4, %p46_p3 }
  0x10   : > { %p201_p7 = scmp.eq.s32.totalorder %s2720_s28, 1  ;;  %p207_p8 = scmp.eq.s32.totalorder %s2323_s29, 1 }
  0x11   : > { %s3262_s12 = scalar_select %p2742_p6, 1, 0 }
  0x12   : > { %p2466_p10 = scmp.lt.s32.totalorder %s2644_s27, 2  ;;  %p2749_p11 = por %p201_p7, %p40_p0 }
  0x13   : > { %p2753_p12 = por %p207_p8, %p46_p3  ;;  %s2758_s15 = sand.u32 1, %s2640_s26  }
  0x14   : > { %s3263_s13 = scalar_select %p2749_p11, 1, 0 }
  0x15   : > { %s3264_s14 = scalar_select %p2753_p12, 1, 0 }
  0x16   : > { %s2399_s16 = sshll.u32 %s2644_s27, 7  ;;  %s2326_s17 = sshll.u32 %s2758_s15, 3 }
  0x17   : > { %s3265_s0 = sld [smem:[#allocation13_spill]]  ;;  %s246_s21 = scalar_lea.vmem [#allocation4], %s2326_s17 }
  0x18   : > { %s254_s22 = sshll.u32 %s246_s21, 4  ;;  %p2769_p13 = pnand %p2466_p10, %p2738_p5  ;;  %s2773_s22 = int_to_ptr.vmem [resolvable:$true] %s254_s22 }
  0x19   : > { %s243_s29 = scalar_lea.sflag [#allocation5], %s2758_s15 }
  0x1a   : > { %p2516_p3 = pneg %p2769_p13 }
  0x1d   : > { %s2765_s20 = scalar_lea.hbm %s3265_s0, %s2399_s16  ;;  %s2519_s16 = scalar_lea.hbm %s3265_s0, 256 }
  0x1e   : > { %s2514_s8 = scalar_lea.hbm %s2765_s20, 128  ;;  %p2520_p5 = scmp.lt.u32.totalorder %s2765_s20, %s3265_s0 }
  0x1f   : > { %p2515_p2 = scmp.ne.s32.totalorder %s2765_s20, %s2514_s8  ;;  %p2521_p8 = scmp.lt.u32.totalorder %s2519_s16, %s2514_s8 }
  0x20   : > { %p2523_p9 = scmp.lt.u32.totalorder %s2514_s8, %s2765_s20 }
  0x21   : > { %p2517_p4 = pnand %p2516_p3, %p2515_p2  ;;  %p2522_p10 = por %p2521_p8, %p2520_p5 }
  0x23   : > { %p2518_p7 = pneg %p2517_p4  ;;  %p2524_p0 = por %p2523_p9, %p2522_p10 }
  0x25   : > { %p2525_p1 = pnand %p2524_p0, %p2518_p7 }
  0x27   : > { %2528 = shalt.err (!%p2525_p1)
}
  0x28   : > { %s2529_s19 = scalar_lea.vmem %s2773_s22, 128  ;;  %s2646_s21 = smov [#allocation4]  }
  0x29   : > { %p2530_p2 = scmp.ne.s32.totalorder %s2773_s22, %s2529_s19  ;;  %s2534_s9 = sshll.u32 %s2646_s21, 4  ;;  %s2535_s9 = int_to_ptr.vmem [resolvable:$false] %s2534_s9 }
  0x2a   : > { %s2536_s11 = scalar_lea.vmem %s2535_s9, 256  ;;  %p2537_p11 = scmp.lt.s32.totalorder %s2773_s22, %s2535_s9 }
  0x2b   : > { %p2532_p4 = pnand %p2530_p2, %p2516_p3  ;;  %p2538_p5 = scmp.lt.s32.totalorder %s2536_s11, %s2529_s19 }
  0x2d   : > { %p2533_p12 = pneg %p2532_p4  ;;  %p2539_p8 = por %p2538_p5, %p2537_p11 }
  0x2f   : > { %p2540_p9 = pnand %p2539_p8, %p2533_p12 }
  0x31   : > { %2543 = shalt.err (!%p2540_p9)
}
  0x32   : > { %2458 = dma.hbm_to_vmem [thread:$0]  (!%p2769_p13), %s2765_s20, 128, %s2773_s22, %s243_s29  }
  0x33   : > { %p3267_p0 = scmp.lt.s32.totalorder %s2644_s27, 3  ;;  %p3268_p1 = scmp.ge.s32.totalorder %s2644_s27, 1 }
  0x34   : > { %s2329_s16 = sshll.u32 %s2758_s15, 2  ;;  %s2330_s17 = sshll.u32 %s2644_s27, 6 }
  0x35   : > { %p2807_p7 = pnand %p3268_p1, %p3267_p0  ;;  %s2816_s21 = scalar_lea.hbm %s3244_s1, %s2330_s17 }
  0x36   : > { %s265_s9 = scalar_lea.vmem [#allocation7], %s2329_s16  ;;  %s262_s20 = scalar_lea.sflag [#allocation8], %s2758_s15 }
  0x37   : > { %s3269_s8 = scalar_select %p2807_p7, 1, 0 }
  0x38   : > { %s272_s11 = sshll.u32 %s265_s9, 4  ;;  %s2544_s22 = scalar_lea.hbm %s2816_s21, 64  ;;  %s273_s11 = int_to_ptr.vmem [resolvable:$true] %s272_s11 }
  0x39   : > { %p2545_p11 = scmp.ne.s32.totalorder %s2816_s21, %s2544_s22  ;;  %s2549_s18 = scalar_lea.hbm %s3244_s1, 128 }
  0x3a   : > { %p2550_p2 = scmp.lt.u32.totalorder %s2816_s21, %s3244_s1  ;;  %p2551_p4 = scmp.lt.u32.totalorder %s2549_s18, %s2544_s22 }
  0x3b   : > { %p2547_p12 = pnand %p2545_p11, %p2516_p3  ;;  %p2553_p8 = scmp.lt.u32.totalorder %s2544_s22, %s2816_s21 }
  0x3c   : > { %p2552_p5 = por %p2551_p4, %p2550_p2 }
  0x3d   : > { %p2548_p10 = pneg %p2547_p12 }
  0x3e   : > { %p2554_p9 = por %p2553_p8, %p2552_p5 }
  0x40   : > { %p2555_p0 = pnand %p2554_p9, %p2548_p10 }
  0x42   : > { %2558 = shalt.err (!%p2555_p0)
}
  0x43   : > { %s2559_s15 = scalar_lea.vmem %s273_s11, 64  ;;  %s2647_s16 = smov [#allocation7]  }
  0x44   : > { %p2560_p1 = scmp.ne.s32.totalorder %s273_s11, %s2559_s15  ;;  %s2564_s0 = sshll.u32 %s2647_s16, 4  ;;  %s2565_s0 = int_to_ptr.vmem [resolvable:$false] %s2564_s0 }
  0x45   : > { %s2566_s9 = scalar_lea.vmem %s2565_s0, 128  ;;  %p2567_p6 = scmp.lt.s32.totalorder %s273_s11, %s2565_s0 }
  0x46   : > { %p2562_p11 = pnand %p2560_p1, %p2516_p3  ;;  %p2568_p7 = scmp.lt.s32.totalorder %s2566_s9, %s2559_s15 }
  0x48   : > { %p2563_p12 = pneg %p2562_p11  ;;  %p2569_p2 = por %p2568_p7, %p2567_p6 }
  0x4a   : > { %p2570_p4 = pnand %p2569_p2, %p2563_p12 }
  0x4c   : > { %2573 = shalt.err (!%p2570_p4)
}
  0x4d   : > { %2461 = dma.hbm_to_vmem [thread:$0]  (!%p2769_p13), %s2816_s21, 64, %s273_s11, %s262_s20  }
  0x4e   : > { %p3270_p10 = scmp.ne.s32.totalorder %s3269_s8, 0 }
  0x4f   : > { %s2841_s22 = sand.u32 (!%p3270_p10), 1, %s2636_s25   ;;  %p3271_p6 = scmp.ne.s32.totalorder (!%p3270_p10), %s3262_s12, 0 }
  0x50   : > { %281 = sbr.rel (%p3270_p10) target bundleno = 1118 (0x45e), region = 48  ;;  %s3253_s29 = sshll.u32 (!%p3270_p10), %s2841_s22, 3 }
  0x51   : > { %s284_s18 = scalar_lea.sflag (!%p3270_p10), [#allocation5], %s2841_s22  ;;  %s2847_s17 = scalar_lea.vmem (!%p3270_p10), [#allocation4], %s3253_s29 }
  0x57   : > { %2619 = dma.done.wait (%p3271_p6), %s284_s18, 128  }
  0x58   : > { %2621 = vsyncadd (%p3271_p6), %s284_s18, 4294967168  ;;  %s2333_s23 = sshll.u32 %s2841_s22, 2  ;;  %s293_s8 = scalar_lea.sflag [#allocation8], %s2841_s22 }
  0x59   : > { %s2855_s21 = scalar_lea.vmem [#allocation7], %s2333_s23 }
  0x5a   : > { %2623 = dma.done.wait (%p3271_p6), %s293_s8, 64  }
  0x5b   : > { %2625 = vsyncadd (%p3271_p6), %s293_s8, 4294967232  ;;  %v2648_v0 = vmov 0.0   ;;  %s2649_s11 = smov 17   ;;  %s3254_s20 = smov 16   ;;  %v338_v1 = vld [vmem:[%s3245_s2 + $0x8] sm:$0xff]  ;;  %v340_v2 = vld [vmem:[%s3245_s2 + $0x18] sm:$0xff] }
  0x5c   : > { %421 = vmatprep.mubr.f32.mxu0 %v2648_v0  ;;  %333 = vst [vmem:[#allocation3] sm:$0xf] %v2648_v0  ;;  %335 = vst [vmem:[#allocation3 + $0xc] sm:$0xf] %v2648_v0  ;;  %520 = vrot.lane.b32.xlu1 %v2648_v0, %s2649_s11  ;;  %v337_v3 = vld [vmem:[%s3245_s2] sm:$0xff]  ;;  %v2401_v4 = vpack.c.bf16 %v340_v2, %v338_v1  ;;  %v339_v5 = vld [vmem:[%s3245_s2 + $0x10] sm:$0xff] }
  0x5d   : > { %599 = vmatprep.mubr.f32.mxu1 %v2648_v0  ;;  %v342_v6 = vld [vmem:[%s3245_s2 + $0x28] sm:$0xff]  ;;  %v344_v7 = vld [vmem:[%s3245_s2 + $0x38] sm:$0xff]  ;;  %v2403_v8 = vpack.c.bf16 %v339_v5, %v337_v3  ;;  %v341_v10 = vld [vmem:[%s3245_s2 + $0x20] sm:$0xff]  ;;  %vm353_vm0 = vcmask 523264   ;;  %s2651_s8 = smov 1   ;;  %s2652_s19 = smov 15  }
  0x5e   : > { %v2405_v9 = vpack.c.bf16 %v344_v7, %v342_v6  ;;  %v343_v11 = vld [vmem:[%s3245_s2 + $0x30] sm:$0xff]  ;;  %v346_v12 = vld [vmem:[%s3245_s2 + $0x48] sm:$0xff]  ;;  %2402 = vmatprep.subr.bf16.mxu0 %v2401_v4  ;;  %v348_v13 = vld [vmem:[%s3245_s2 + $0x58] sm:$0xff]  ;;  %701 = vrot.lane.b32.xlu0 %v2648_v0, %s2652_s19  ;;  %s2653_s12 = smov 127   ;;  %s2655_s15 = smov 112   ;;  %v2657_v34 = vmov 0  }
  0x5f   : > { %2404 = vmatpush1.bf16.msra.mxu0 %v2403_v8  ;;  %v2407_v14 = vpack.c.bf16 %v343_v11, %v341_v10  ;;  %v2409_v15 = vpack.c.bf16 %v348_v13, %v346_v12  ;;  %v345_v16 = vld [vmem:[%s3245_s2 + $0x40] sm:$0xff]  ;;  %v347_v17 = vld [vmem:[%s3245_s2 + $0x50] sm:$0xff]  ;;  %v350_v18 = vld [vmem:[%s3245_s2 + $0x68] sm:$0xff]  ;;  %s2656_s16 = smov 111   ;;  %2510 = vset.pattern.permute.xlu0 %v2657_v34  ;;  %vm526_vm1 = vcmask 138240   ;;  %vm531_vm2 = vcmask 64512  }
  0x60   : > { %612 = vrot.lane.b32.xlu1 %v2648_v0, %s3254_s20  ;;  %2406 = vmatprep.subr.bf16.mxu0 %v2405_v9  ;;  %v352_v19 = vld [vmem:[%s3245_s2 + $0x78] sm:$0xff]  ;;  %v2411_v20 = vpack.c.bf16 %v347_v17, %v345_v16  ;;  %v349_v22 = vld [vmem:[%s3245_s2 + $0x60] sm:$0xff]  ;;  %v351_v23 = vld [vmem:[%s3245_s2 + $0x70] sm:$0xff]  ;;  %vm618_vm3 = vcmask 130048   ;;  %vm707_vm4 = vcmask 121856   ;;  %vm798_vm5 = vcmask 7168  }
  0x61   : > { %v2413_v21 = vpack.c.bf16 %v352_v19, %v350_v18  ;;  %v2415_v24 = vpack.c.bf16 %v351_v23, %v349_v22  ;;  %v336_v25 = vld [vmem:[%s2855_s21] sm:$0xf]  ;;  %v428_v26 = vld [vmem:[%s2847_s17] sm:$0xff]  ;;  %s3272_s17 = smov 16   ;;  %s2654_s21 = smov 113   ;;  %vm3257_vm6 = vcmask 924672  }
  0x62   : > { %432 = vst [vmem:[#allocation2 + $0x8] sm:$0xf] %v428_v26  ;;  %v430_v27 = vcombine.high %v428_v26, %v428_v26  ;;  %v1327_v35 = vld [vmem:[%s3247_s4] sm:$0xf]  ;;  %v2343_v54 = vld [vmem:[%s3246_s3 + $0x4] sm:$0xf] }
  0x63   : > { %2408 = vmatpush1.bf16.msra.mxu0 %v2407_v14  ;;  %v516_v50 = vld [vmem:[%s3246_s3] sm:$0xf]  ;;  %v2345_v60 = vld [vmem:[%s3246_s3 + $0x8] sm:$0xf]  ;;  %v2347_v1 = vld [vmem:[%s3246_s3 + $0xc] sm:$0xf] }
  0x64   : > { %2410 = vmatprep.subr.bf16.mxu0 %v2409_v15  ;;  %792 = vrot.lane.b32.xlu1 %v2648_v0, %s2651_s8  ;;  %433 = vst [vmem:[#allocation2 + $0x10] sm:$0xf] %v430_v27  ;;  %vm3259_vm7 = vcmask 1039360   ;;  %v2349_v7 = vld [vmem:[%s3246_s3 + $0x10] sm:$0xf]  ;;  %vm3258_vm8 = vcmask 916480  }
  0x65   : > { %v2351_v8 = vld [vmem:[%s3246_s3 + $0x14] sm:$0xf]  ;;  %v2353_v13 = vld [vmem:[%s3246_s3 + $0x18] sm:$0xf]  ;;  %vm3256_vm9 = vcmask 908288   ;;  %s2216_s9 = scalar_lea.sflag [#allocation6], %s2841_s22 }
  0x66   : > { %v2357_v18 = vld [vmem:[%s3246_s3 + $0x20] sm:$0xf]  ;;  %v1912_v22 = vld [vmem:[#allocation3 + $0xc] sm:$0xf]  ;;  %p3282_p3 = scmp.ne.s32.totalorder %s3263_s13, 0 }
  0x67   : > { %2412 = vmatpush1.bf16.msra.mxu0 %v2411_v20  ;;  %v2355_v20 = vld [vmem:[%s3246_s3 + $0x1c] sm:$0xf]  ;;  %v1815_v23 = vld [vmem:[#allocation3 + $0xc] sm:$0xf] }
  0x68   : > { %2414 = vmatprep.subr.bf16.mxu0 %v2413_v21  ;;  %971 = vrot.lane.b32.xlu1 %v2648_v0, %s2653_s12 }
  0x6b   : > { %2416 = vmatpush1.bf16.msra.mxu0 %v2415_v24  ;;  %v442_v24 = vlaneseq }
  0x6e   : > { %2335 = vmatmul.mubr.msk.f32.vlgmr.msra.gmra.mrb[0].mxu0 %vm353_vm0, %v336_v25  ;;  %v443_v25 = vand.u32 127, %v442_v24 }
  0x6f   : > { %1045 = vmatprep.mubr.f32.mxu0 %v2648_v0 }
  0x70   : > { %v444_v26 = vadd.s32 128, %v443_v25 }
  0xce   : > { %v521_v36 = vpop.permute.xlu1 %520 }
  0xd0   : > { %v702_v39 = vpop.permute.xlu0 %701 }
  0xd2   : > { %v613_v37 = vpop.permute.xlu1 %612 }
  0xd6   : > { %v793_v38 = vpop.permute.xlu1 %792 }
  0xda   : > { %v972_v40 = vpop.permute.xlu1 %971 }
 0x141   : > { %v423_v28 = vpop.f32.mrb[0].mxu0 }
 0x142   : > { %v436_v29 = vrot.slane %v423_v28, 4  ;;  %v425_v30 = vpop.f32.mrb[1].mxu0  ;;  %v3036_v27 = vmul.u32.u64.low 2863311531, %v443_v25  ;;  %v3037_v28 = vmul.u32.u64.high 2863311531, %v443_v25, %v3036_v27 }
 0x143   : > { %v437_v31 = vrot.slane %v425_v30, 4 }
 0x144   : > { %440 = vst [vmem:[#allocation2 + $0x8] sm:$0xf0] %v436_v29  ;;  %v3039_v29 = vmul.u32.u64.low 2863311531, %v444_v26  ;;  %v3040_v30 = vmul.u32.u64.high 2863311531, %v444_v26, %v3039_v29 }
 0x145   : > { %441 = vst [vmem:[#allocation2 + $0x10] sm:$0xf0] %v437_v31  ;;  %v451_v31 = vshrl.u32 %v3037_v28, 8 }
 0x14b   : > { %v2926_v32 = vld [vmem:[#allocation2 + $0x8] sm:$0xff] }
 0x14c   : > { %522 = vrot.lane.b32.xlu0 %v2926_v32, %s2649_s11  ;;  %614 = vrot.lane.b32.xlu1 %v2926_v32, %s3272_s17  ;;  %v2936_v33 = vld [vmem:[#allocation2 + $0x10] sm:$0xff] }
 0x150   : > { %703 = vrot.lane.b32.xlu0 %v2926_v32, %s2652_s19  ;;  %794 = vrot.lane.b32.xlu1 %v2926_v32, %s2651_s8 }
 0x154   : > { %967 = vrot.lane.b32.xlu0 %v2926_v32, %s2653_s12  ;;  %705 = vrot.lane.b32.xlu1 %v2936_v33, %s2652_s19 }
 0x158   : > { %524 = vrot.lane.b32.xlu0 %v2936_v33, %s2649_s11  ;;  %1058 = vrot.lane.b32.xlu1 %v2926_v32, %s2654_s21 }
 0x15c   : > { %616 = vrot.lane.b32.xlu0 %v2936_v33, %s3272_s17  ;;  %1153 = vrot.lane.b32.xlu1 %v2648_v0, %s2655_s15 }
 0x160   : > { %1062 = vrot.lane.b32.xlu0 %v2648_v0, %s2654_s21  ;;  %1060 = vrot.lane.b32.xlu1 %v2936_v33, %s2654_s21 }
 0x164   : > { %796 = vrot.lane.b32.xlu0 %v2936_v33, %s2651_s8  ;;  %1242 = vrot.lane.b32.xlu1 %v2648_v0, %s2656_s16 }
 0x168   : > { %969 = vrot.lane.b32.xlu0 %v2936_v33, %s2653_s12  ;;  %1238 = vrot.lane.b32.xlu1 %v2926_v32, %s2656_s16 }
 0x16c   : > { %1151 = vrot.lane.b32.xlu0 %v2936_v33, %s2655_s15  ;;  %1825 = vrot.lane.b32.xlu1 %v1815_v23, %s2653_s12 }
 0x170   : > { %1240 = vrot.lane.b32.xlu0 %v2936_v33, %s2656_s16 }
 0x174   : > { %1149 = vrot.lane.b32.xlu0 %v2926_v32, %s2655_s15 }
 0x178   : > { %1330 = vperm.xlu0 %2510, %v1327_v35  }
 0x17c   : > { %1922 = vrot.lane.b32.xlu0 %v1912_v22, %s2654_s21 }
 0x1be   : > { %v523_v41 = vpop.permute.xlu0 %522  ;;  %v615_v42 = vpop.permute.xlu1 %614 }
 0x1bf   : > { %v527_v51 = vsel %vm526_vm1, %v521_v36, %v523_v41  ;;  %v619_v55 = vsel %vm618_vm3, %v613_v37, %v615_v42 }
 0x1c2   : > { %v704_v43 = vpop.permute.xlu0 %703  ;;  %v795_v44 = vpop.permute.xlu1 %794 }
 0x1c3   : > { %v708_v58 = vsel %vm707_vm4, %v702_v39, %v704_v43  ;;  %v799_v2 = vsel %vm798_vm5, %v793_v38, %v795_v44 }
 0x1c6   : > { %v968_v45 = vpop.permute.xlu0 %967  ;;  %v706_v46 = vpop.permute.xlu1 %705 }
 0x1c7   : > { %v709_v57 = vsel %vm707_vm4, %v704_v43, %v706_v46 }
 0x1ca   : > { %v525_v47 = vpop.permute.xlu0 %524  ;;  %v1059_v48 = vpop.permute.xlu1 %1058 }
 0x1cb   : > { %v528_v49 = vsel %vm526_vm1, %v523_v41, %v525_v47 }
 0x1cc   : > { %535 = vmatprep.subr.mxu1 %v528_v49 }
 0x1cd   : > { %536 = vmatpush1.msra.mxu1 %v527_v51 }
 0x1ce   : > { %v617_v52 = vpop.permute.xlu0 %616  ;;  %2342 = vmatmul.mubr.msk.f32.vlgmr.msra.gmra.mrb[0].mxu1 %vm531_vm2, %v516_v50  ;;  %v1154_v56 = vpop.permute.xlu1 %1153 }
 0x1cf   : > { %v620_v53 = vsel %vm618_vm3, %v615_v42, %v617_v52  ;;  %690 = vmatprep.mubr.f32.mxu1 %v2648_v0 }
 0x1d0   : > { %626 = vmatprep.subr.mxu1 %v620_v53 }
 0x1d1   : > { %627 = vmatpush1.msra.mxu1 %v619_v55 }
 0x1d2   : > { %v1063_v59 = vpop.permute.xlu0 %1062  ;;  %2344 = vmatmul.mubr.msk.f32.vlgmr.msra.gmra.mrb[2].mxu1 %vm531_vm2, %v2343_v54  ;;  %715 = vmatprep.subr.mxu1 %v709_v57  ;;  %v1061_v61 = vpop.permute.xlu1 %1060 }
 0x1d3   : > { %716 = vmatpush1.msra.mxu1 %v708_v58  ;;  %779 = vmatprep.mubr.f32.mxu1 %v2648_v0  ;;  %v1066_v6 = vsel %vm3257_vm6, %v1061_v61, %v1063_v59  ;;  %v1065_v10 = vsel %vm3257_vm6, %v1059_v48, %v1061_v61 }
 0x1d6   : > { %v797_v62 = vpop.permute.xlu0 %796  ;;  %2346 = vmatmul.mubr.msk.f32.vlgmr.msra.gmra.mrb[4].mxu1 %vm531_vm2, %v2345_v60  ;;  %v1243_v9 = vpop.permute.xlu1 %1242 }
 0x1d7   : > { %v800_v63 = vsel %vm798_vm5, %v795_v44, %v797_v62  ;;  %870 = vmatprep.mubr.f32.mxu1 %v2648_v0 }
 0x1d8   : > { %806 = vmatprep.subr.mxu1 %v800_v63 }
 0x1d9   : > { %807 = vmatpush1.msra.mxu1 %v799_v2 }
 0x1da   : > { %v970_v3 = vpop.permute.xlu0 %969  ;;  %2348 = vmatmul.mubr.msk.f32.vlgmr.msra.gmra.mrb[6].mxu1 %vm531_vm2, %v2347_v1  ;;  %886 = vmatprep.subr.mxu1 %v2936_v33  ;;  %v1239_v14 = vpop.permute.xlu1 %1238  ;;  %v452_v33 = vmul.u32 384, %v451_v31 }
 0x1db   : > { %v974_v4 = vsel %vm3259_vm7, %v968_v45, %v970_v3  ;;  %887 = vmatpush1.msra.mxu1 %v2926_v32  ;;  %v975_v5 = vsel %vm3259_vm7, %v970_v3, %v972_v40  ;;  %950 = vmatprep.mubr.f32.mxu1 %v2648_v0  ;;  %v462_v32 = vshrl.u32 %v3040_v30, 8 }
 0x1dc   : > { %981 = vmatprep.subr.mxu0 %v975_v5  ;;  %1072 = vmatprep.subr.mxu1 %v1066_v6  ;;  %v453_v35 = vsub.s32 %v443_v25, %v452_v33 }
 0x1dd   : > { %982 = vmatpush1.msra.mxu0 %v974_v4  ;;  %v463_v34 = vmul.u32 384, %v462_v32 }
 0x1de   : > { %v1152_v11 = vpop.permute.xlu0 %1151  ;;  %2350 = vmatmul.mubr.msk.f32.vlgmr.msra.gmra.mrb[2].mxu1 %vm531_vm2, %v2349_v7  ;;  %2352 = vmatmul.mubr.msk.f32.vlgmr.msra.gmra.mrb[2].mxu0 %vm531_vm2, %v2351_v8  ;;  %vm467_vm10 = vcmp.ne.s32.totalorder %v453_v35, 0  ;;  %vm469_vm11 = vcmp.lt.s32.totalorder %v453_v35, 0  ;;  %v473_v37 = vadd.s32 384, %v453_v35 }
 0x1df   : > { %1073 = vmatpush1.msra.mxu1 %v1065_v10  ;;  %v1157_v12 = vsel %vm3258_vm8, %v1152_v11, %v1154_v56  ;;  %1136 = vmatprep.mubr.f32.mxu1 %v2648_v0  ;;  %v464_v36 = vsub.s32 %v444_v26, %v463_v34  ;;  %vm471_vm14 = vmand %vm469_vm11, %vm467_vm10 }
 0x1e0   : > { %1163 = vmatprep.subr.mxu1 %v1157_v12  ;;  %1316 = vmatprep.mubr.f32.mxu0 %v2648_v0  ;;  %v475_v39 = vsel %vm471_vm14, %v473_v37, %v453_v35 }
 0x1e1   : > { %vm468_vm12 = vcmp.ne.s32.totalorder %v464_v36, 0  ;;  %vm470_vm13 = vcmp.lt.s32.totalorder %v464_v36, 0  ;;  %v474_v38 = vadd.s32 384, %v464_v36  ;;  %v478_v41 = vsub.s32 0, %v475_v39 }
 0x1e2   : > { %v1241_v15 = vpop.permute.xlu0 %1240  ;;  %2354 = vmatmul.mubr.msk.f32.vlgmr.msra.gmra.mrb[8].mxu1 %vm531_vm2, %v2353_v13  ;;  %vm472_vm15 = vmand %vm470_vm13, %vm468_vm12  ;;  %vm477_vm0 = vcmp.lt.s32.totalorder %v475_v39, 0 }
 0x1e3   : > { %v1245_v16 = vsel %vm3256_vm9, %v1239_v14, %v1241_v15  ;;  %v1246_v17 = vsel %vm3256_vm9, %v1241_v15, %v1243_v9  ;;  %1227 = vmatprep.mubr.f32.mxu1 %v2648_v0  ;;  %v476_v40 = vsel %vm472_vm15, %v474_v38, %v464_v36  ;;  %v2336_v43 = vmin.u32 %v478_v41, %v475_v39 }
 0x1e4   : > { %1252 = vmatprep.subr.mxu0 %v1246_v17  ;;  %v485_v42 = vsub.s32 0, %v476_v40 }
 0x1e5   : > { %1253 = vmatpush1.msra.mxu0 %v1245_v16  ;;  %v481_v45 = vand.u32 15, %v2336_v43 }
 0x1e6   : > { %v1150_v19 = vpop.permute.xlu0 %1149  ;;  %2358 = vmatmul.mubr.msk.f32.vlgmr.msra.gmra.mrb[4].mxu0 %vm531_vm2, %v2357_v18  ;;  %v2337_v44 = vmin.u32 %v485_v42, %v476_v40 }
 0x1e7   : > { %v1156_v21 = vsel %vm3258_vm8, %v1150_v19, %v1152_v11  ;;  %1429 = vmatprep.mubr.f32.mxu0 %v2648_v0  ;;  %v482_v47 = vsub.s32 0, %v481_v45 }
 0x1e8   : > { %1164 = vmatpush1.msra.mxu1 %v1156_v21  ;;  %v488_v46 = vand.u32 15, %v2337_v44 }
 0x1e9   : > { %2356 = vmatmul.mubr.msk.f32.vlgmr.msra.gmra.mrb[2].mxu1 %vm531_vm2, %v2355_v20  ;;  %vm484_vm2 = vcmp.lt.s32.totalorder %v476_v40, 0  ;;  %v483_v49 = vsel %vm477_vm0, %v482_v47, %v481_v45  ;;  %v2009_v47 = vld [vmem:[#allocation3 + $0xc] sm:$0xf]  ;;  %vm3279_vm0 = vcmask 908288  }
 0x1ea   : > { %1526 = vmatprep.mubr.f32.mxu1 %v2648_v0  ;;  %v489_v48 = vsub.s32 0, %v488_v46  ;;  %vm491_vm9 = vcmp.ne.s32.totalorder %v483_v49, 0  ;;  %vm493_vm6 = vcmp.lt.s32.totalorder %v483_v49, 0  ;;  %v497_v51 = vadd.s32 16, %v483_v49 }
 0x1eb   : > { %vm495_vm11 = vmand %vm493_vm6, %vm491_vm9  ;;  %vm1360_vm6 = vcmask 1043456  }
 0x1ec   : > { %v490_v50 = vsel %vm484_vm2, %v489_v48, %v488_v46  ;;  %v499_v53 = vsel %vm495_vm11, %v497_v51, %v483_v49  ;;  %v2200_v48 = vld [vmem:[%s3249_s6] sm:$0xf]  ;;  %v2104_v49 = vld [vmem:[#allocation3 + $0xc] sm:$0xf]  ;;  %v1826_v51 = vpop.permute.xlu1 %1825  ;;  %vm3280_vm2 = vmmov %vm3279_vm0 }
 0x1ed   : > { %vm492_vm8 = vcmp.ne.s32.totalorder %v490_v50, 0  ;;  %vm494_vm10 = vcmp.lt.s32.totalorder %v490_v50, 0  ;;  %v498_v52 = vadd.s32 16, %v490_v50  ;;  %vm501_vm13 = vcmp.ne.s32.totalorder %v499_v53, 0 }
 0x1ee   : > { %vm496_vm12 = vmand %vm494_vm10, %vm492_vm8  ;;  %vm507_vm14 = vcmp.ne.s32.totalorder %v499_v53, 15  ;;  %v3045_v57 = vsel %vm501_vm13, 1.0, %v2648_v0  ;;  %vm3277_vm8 = vcmask 924672  }
 0x1ef   : > { %v500_v55 = vsel %vm496_vm12, %v498_v52, %v490_v50  ;;  %v3048_v58 = vsel %vm507_vm14, 1.0, %v2648_v0  ;;  %vm3278_vm9 = vmmov %vm3277_vm8 }
 0x1f0   : > { %vm502_vm15 = vcmp.ne.s32.totalorder %v500_v55, 0  ;;  %vm508_vm7 = vcmp.ne.s32.totalorder %v500_v55, 15 }
 0x1f1   : > { %v3051_v59 = vsel %vm502_vm15, 1.0, %v2648_v0  ;;  %v3054_v60 = vsel %vm508_vm7, 1.0, %v2648_v0  ;;  %vm1356_vm7 = vcmask 31744  }
 0x1f7   : > { %v1331_v32 = vpop.permute.xlu0 %1330 }
 0x1fb   : > { %v3100_v50 = vpop.permute.xlu0 %1922 }
 0x2a1   : > { %v601_v54 = vpop.f32.mrb[0].mxu1 }
 0x2a2   : > { %v603_v56 = vpop.f32.mrb[1].mxu1  ;;  %v606_v62 = vmul.f32 %v3045_v57, %v601_v54 }
 0x2a3   : > { %v607_v2 = vmul.f32 %v3051_v59, %v603_v56 }
 0x2a9   : > { %v781_v61 = vpop.f32.mrb[4].mxu1 }
 0x2aa   : > { %v786_v63 = vmul.f32 %v3048_v58, %v781_v61  ;;  %v783_v1 = vpop.f32.mrb[5].mxu1 }
 0x2ab   : > { %v787_v3 = vmul.f32 %v3054_v60, %v783_v1 }
 0x2ac   : > { %v2417_v4 = vadd.f32 %v786_v63, %v606_v62 }
 0x2ad   : > { %v2422_v5 = vadd.f32 %v787_v3, %v607_v2  ;;  %v872_v6 = vpop.f32.mrb[6].mxu1  ;;  %v2362_v3 = vld [vmem:[%s3248_s5 + $0x4] sm:$0xf] }
 0x2ae   : > { %v877_v7 = vmul.f32 %v3045_v57, %v872_v6  ;;  %v874_v8 = vpop.f32.mrb[7].mxu1 }
 0x2af   : > { %v878_v9 = vmul.f32 %v3051_v59, %v874_v8 }
 0x2b0   : > { %v2418_v10 = vadd.f32 %v2417_v4, %v877_v7 }
 0x2b1   : > { %v2423_v11 = vadd.f32 %v2422_v5, %v878_v9  ;;  %v1047_v12 = vpop.f32.mrb[2].mxu0 }
 0x2b2   : > { %v1052_v13 = vmul.f32 %v3048_v58, %v1047_v12  ;;  %v1049_v14 = vpop.f32.mrb[3].mxu0 }
 0x2b3   : > { %v1053_v15 = vmul.f32 %v3054_v60, %v1049_v14 }
 0x2b4   : > { %v2419_v16 = vadd.f32 %v2418_v10, %v1052_v13  ;;  %v2370_v10 = vld [vmem:[%s3248_s5 + $0xc] sm:$0xf] }
 0x2b5   : > { %v2424_v17 = vadd.f32 %v2423_v11, %v1053_v15  ;;  %v1138_v18 = vpop.f32.mrb[8].mxu1  ;;  %v1344_v15 = vld [vmem:[%s3248_s5] sm:$0xf] }
 0x2b6   : > { %v1143_v19 = vmul.f32 %v3045_v57, %v1138_v18  ;;  %v1140_v20 = vpop.f32.mrb[9].mxu1 }
 0x2b7   : > { %v1144_v21 = vmul.f32 %v3051_v59, %v1140_v20 }
 0x2b8   : > { %v2420_v22 = vadd.f32 %v2419_v16, %v1143_v19 }
 0x2b9   : > { %v1318_v23 = vpop.f32.mrb[4].mxu0  ;;  %v2425_v24 = vadd.f32 %v2424_v17, %v1144_v21  ;;  %v2374_v17 = vld [vmem:[%s3248_s5 + $0x10] sm:$0xf] }
 0x2ba   : > { %v1320_v25 = vpop.f32.mrb[5].mxu0  ;;  %v1323_v26 = vmul.f32 %v3048_v58, %v1318_v23 }
 0x2bb   : > { %v1324_v28 = vmul.f32 %v3054_v60, %v1320_v25 }
 0x2bc   : > { %v1229_v27 = vpop.f32.mrb[2].mxu1 }
 0x2bd   : > { %v2421_v29 = vadd.f32 %v2420_v22, %v1229_v27  ;;  %v1231_v30 = vpop.f32.mrb[3].mxu1  ;;  %v2366_v22 = vld [vmem:[%s3248_s5 + $0x8] sm:$0xf]  ;;  %v2378_v27 = vld [vmem:[%s3248_s5 + $0x14] sm:$0xf] }
 0x2be   : > { %v2426_v31 = vadd.f32 %v2425_v24, %v1231_v30  ;;  %v2386_v30 = vld [vmem:[%s3248_s5 + $0x1c] sm:$0xf] }
 0x2bf   : > { %v1325_v33 = vadd.f32 %v2421_v29, %v1323_v26 }
 0x2c0   : > { %v1326_v34 = vadd.f32 %v2426_v31, %v1324_v28 }
 0x2c1   : > { %v1333_v35 = vadd.f32 %v1331_v32, %v1325_v33 }
 0x2c2   : > { %v1334_v36 = vadd.f32 %v1331_v32, %v1326_v34  ;;  %v2382_v34 = vld [vmem:[%s3248_s5 + $0x18] sm:$0xf] }
 0x2c3   : > { %v1335_v37 = vmax.f32 %v1333_v35, 0.0 }
 0x2c4   : > { %v1336_v38 = vmax.f32 %v1334_v36, 0.0 }
 0x2c6   : > { %v3068_v39 = vcombine.low %v1335_v37, %v1336_v38  ;;  %v2513_v46 = vcombine.low %v1336_v38, %v1336_v38  ;;  %v2390_v38 = vld [vmem:[%s3248_s5 + $0x20] sm:$0xf] }
 0x2c8   : > { %1341 = vst [vmem:[#allocation3 + $0x4] sm:$0xff] %v3068_v39 }
 0x2cf   : > { %v1343_v40 = vld [vmem:[#allocation3 + $0x8] sm:$0xf]  ;;  %v1342_v41 = vld [vmem:[#allocation3] sm:$0xff] }
 0x2d0   : > { %1352 = vrot.lane.b32.xlu1 %v1343_v40, %s2649_s11  ;;  %1348 = vrot.lane.b32.xlu0 %v1342_v41, %s2649_s11  ;;  %v1441_v42 = vld [vmem:[#allocation3 + $0x8] sm:$0xf]  ;;  %v1347_v43 = vcombine.high %v1342_v41, %v1342_v41 }
 0x2d1   : > { %v1536_v44 = vld [vmem:[#allocation3 + $0x8] sm:$0xf] }
 0x2d2   : > { %v1633_v45 = vld [vmem:[#allocation3 + $0x8] sm:$0xf] }
 0x2d4   : > { %1451 = vrot.lane.b32.xlu1 %v1441_v42, %s3272_s17  ;;  %1542 = vrot.lane.b32.xlu0 %v1342_v41, %s2652_s19 }
 0x2d8   : > { %1447 = vrot.lane.b32.xlu1 %v1342_v41, %s3272_s17  ;;  %1821 = vrot.lane.b32.xlu0 %v3068_v39, %s2653_s12 }
 0x2dc   : > { %1546 = vrot.lane.b32.xlu1 %v1536_v44, %s2652_s19  ;;  %1449 = vrot.lane.b32.xlu0 %v1347_v43, %s3272_s17 }
 0x2e0   : > { %1643 = vrot.lane.b32.xlu1 %v1633_v45, %s2651_s8  ;;  %1544 = vrot.lane.b32.xlu0 %v1347_v43, %s2652_s19 }
 0x2e4   : > { %1639 = vrot.lane.b32.xlu1 %v1342_v41, %s2651_s8  ;;  %1641 = vrot.lane.b32.xlu0 %v1347_v43, %s2651_s8 }
 0x2e8   : > { %1823 = vrot.lane.b32.xlu0 %v2513_v46, %s2653_s12  ;;  %1350 = vrot.lane.b32.xlu1 %v1347_v43, %s2649_s11 }
 0x2ec   : > { %2017 = vrot.lane.b32.xlu0 %v2513_v46, %s2655_s15  ;;  %1918 = vrot.lane.b32.xlu1 %v3068_v39, %s2654_s21 }
 0x2f0   : > { %2112 = vrot.lane.b32.xlu0 %v2513_v46, %s2656_s16  ;;  %2019 = vrot.lane.b32.xlu1 %v2009_v47, %s2655_s15 }
 0x2f4   : > { %2015 = vrot.lane.b32.xlu0 %v3068_v39, %s2655_s15  ;;  %1920 = vrot.lane.b32.xlu1 %v2513_v46, %s2654_s21  ;;  %s2400_s15 = sshll.u32 %s2720_s28, 7  ;;  %s2658_s28 = smov [#allocation9]  }
 0x2f5   : > { %s3199_s0 = scalar_lea.hbm %s3250_s7, %s2400_s15  ;;  %s2578_s19 = sshll.u32 %s2658_s28, 4  ;;  %s2579_s19 = int_to_ptr.vmem [resolvable:$false] %s2578_s19 }
 0x2f6   : > { %s2580_s11 = scalar_lea.vmem %s2579_s19, 256 }
 0x2f8   : > { %2203 = vperm.xlu0 %2510, %v2200_v48   ;;  %2114 = vrot.lane.b32.xlu1 %v2104_v49, %s2656_s16 }
 0x2fc   : > { %2110 = vrot.lane.b32.xlu1 %v3068_v39, %s2656_s16  ;;  %s3281_s16 = sshll.u32 %s2841_s22, 3 }
 0x2fd   : > { %s331_s18 = scalar_lea.vmem [#allocation9], %s3281_s16 }
 0x2fe   : > { %s2230_s29 = sshll.u32 %s331_s18, 4  ;;  %s3201_s29 = int_to_ptr.vmem [resolvable:$true] %s2230_s29 }
 0x2ff   : > { %s2574_s8 = scalar_lea.vmem %s3201_s29, 128  ;;  %p2581_p8 = scmp.lt.s32.totalorder %s3201_s29, %s2579_s19 }
 0x300   : > { %p2575_p13 = scmp.ne.s32.totalorder %s3201_s29, %s2574_s8  ;;  %p2582_p9 = scmp.lt.s32.totalorder %s2580_s11, %s2574_s8 }
 0x302   : > { %p2576_p7 = pnand %p2575_p13, %p3282_p3  ;;  %p2583_p0 = por %p2582_p9, %p2581_p8 }
 0x304   : > { %p2577_p5 = pneg %p2576_p7 }
 0x306   : > { %p2584_p1 = pnand %p2583_p0, %p2577_p5 }
 0x342   : > { %v1349_v52 = vpop.permute.xlu0 %1348  ;;  %v1353_v53 = vpop.permute.xlu1 %1352 }
 0x346   : > { %v1543_v54 = vpop.permute.xlu0 %1542  ;;  %v1452_v55 = vpop.permute.xlu1 %1451 }
 0x34a   : > { %v1822_v56 = vpop.permute.xlu0 %1821  ;;  %v1448_v61 = vpop.permute.xlu1 %1447 }
 0x34e   : > { %v1450_v62 = vpop.permute.xlu0 %1449  ;;  %v1547_v63 = vpop.permute.xlu1 %1546 }
 0x34f   : > { %v1453_v1 = vsel %vm618_vm3, %v1448_v61, %v1450_v62  ;;  %v1454_v2 = vsel %vm618_vm3, %v1450_v62, %v1452_v55 }
 0x350   : > { %2363 = vmatprep.subr.msk.mxu1 %vm1360_vm6, %v1454_v2 }
 0x351   : > { %2364 = vmatpush1.msk.msra.mxu1 %vm1360_vm6, %v1453_v1 }
 0x352   : > { %v1545_v4 = vpop.permute.xlu0 %1544  ;;  %v1644_v5 = vpop.permute.xlu1 %1643  ;;  %2365 = vmatmul.mubr.msk.f32.vlgmr.msra.gmra.mrb[10].mxu1 %vm1356_vm7, %v2362_v3 }
 0x353   : > { %1718 = vmatprep.mubr.f32.mxu1 %v2648_v0  ;;  %v1549_v16 = vsel %vm707_vm4, %v1545_v4, %v1547_v63  ;;  %v1548_v18 = vsel %vm707_vm4, %v1543_v54, %v1545_v4  ;;  %vm3275_vm4 = vcmask 916480  }
 0x356   : > { %v1642_v6 = vpop.permute.xlu0 %1641  ;;  %v1640_v7 = vpop.permute.xlu1 %1639 }
 0x357   : > { %v1646_v8 = vsel %vm798_vm5, %v1642_v6, %v1644_v5  ;;  %v1645_v9 = vsel %vm798_vm5, %v1640_v7, %v1642_v6  ;;  %vm3276_vm5 = vmmov %vm3275_vm4 }
 0x358   : > { %2371 = vmatprep.subr.msk.mxu1 %vm1360_vm6, %v1646_v8 }
 0x359   : > { %2372 = vmatpush1.msk.msra.mxu1 %vm1360_vm6, %v1645_v9 }
 0x35a   : > { %v1824_v11 = vpop.permute.xlu0 %1823  ;;  %2375 = vmatprep.subr.msk.mxu1 %vm1360_vm6, %v2513_v46  ;;  %v1351_v12 = vpop.permute.xlu1 %1350  ;;  %2373 = vmatmul.mubr.msk.f32.vlgmr.msra.gmra.mrb[12].mxu1 %vm1356_vm7, %v2370_v10 }
 0x35b   : > { %v1354_v13 = vsel %vm526_vm1, %v1349_v52, %v1351_v12  ;;  %v1355_v14 = vsel %vm526_vm1, %v1351_v12, %v1353_v53  ;;  %2376 = vmatpush1.msk.msra.mxu1 %vm1360_vm6, %v3068_v39  ;;  %1805 = vmatprep.mubr.f32.mxu1 %v2648_v0  ;;  %vm3273_vm1 = vcmask 1039360  }
 0x35c   : > { %2359 = vmatprep.subr.msk.mxu0 %vm1360_vm6, %v1355_v14  ;;  %v1828_v21 = vsel %vm3273_vm1, %v1824_v11, %v1826_v51  ;;  %vm3274_vm3 = vmmov %vm3273_vm1 }
 0x35d   : > { %2360 = vmatpush1.msk.msra.mxu0 %vm1360_vm6, %v1354_v13  ;;  %v1827_v23 = vsel %vm3274_vm3, %v1822_v56, %v1824_v11 }
 0x35e   : > { %v2018_v19 = vpop.permute.xlu0 %2017  ;;  %2361 = vmatmul.mubr.msk.f32.vlgmr.msra.gmra.mrb[6].mxu0 %vm1356_vm7, %v1344_v15  ;;  %2367 = vmatprep.subr.msk.mxu0 %vm1360_vm6, %v1549_v16  ;;  %v1919_v20 = vpop.permute.xlu1 %1918 }
 0x35f   : > { %2368 = vmatpush1.msk.msra.mxu0 %vm1360_vm6, %v1548_v18  ;;  %1621 = vmatprep.mubr.f32.mxu0 %v2648_v0 }
 0x360   : > { %2379 = vmatprep.subr.msk.mxu0 %vm1360_vm6, %v1828_v21  ;;  %2377 = vmatmul.mubr.msk.f32.vlgmr.msra.gmra.mrb[10].mxu1 %vm1356_vm7, %v2374_v17 }
 0x361   : > { %2094 = vmatprep.mubr.f32.mxu1 %v2648_v0 }
 0x362   : > { %v2113_v24 = vpop.permute.xlu0 %2112  ;;  %2369 = vmatmul.mubr.msk.f32.vlgmr.msra.gmra.mrb[8].mxu0 %vm1356_vm7, %v2366_v22  ;;  %v2020_v25 = vpop.permute.xlu1 %2019 }
 0x363   : > { %2380 = vmatpush1.msk.msra.mxu0 %vm1360_vm6, %v1827_v23  ;;  %v2022_v26 = vsel %vm3275_vm4, %v2018_v19, %v2020_v25  ;;  %1900 = vmatprep.mubr.f32.mxu0 %v2648_v0 }
 0x364   : > { %2387 = vmatprep.subr.msk.mxu1 %vm1360_vm6, %v2022_v26 }
 0x366   : > { %v2016_v28 = vpop.permute.xlu0 %2015  ;;  %2381 = vmatmul.mubr.msk.f32.vlgmr.msra.gmra.mrb[10].mxu0 %vm1356_vm7, %v2378_v27  ;;  %v1921_v29 = vpop.permute.xlu1 %1920 }
 0x367   : > { %v2021_v31 = vsel %vm3276_vm5, %v2016_v28, %v2018_v19  ;;  %v1924_v32 = vsel %vm3277_vm8, %v1919_v20, %v1921_v29  ;;  %v1925_v33 = vsel %vm3278_vm9, %v1921_v29, %v3100_v50  ;;  %1997 = vmatprep.mubr.f32.mxu0 %v2648_v0 }
 0x368   : > { %2383 = vmatprep.subr.msk.mxu0 %vm1360_vm6, %v1925_v33  ;;  %2388 = vmatpush1.msk.msra.mxu1 %vm1360_vm6, %v2021_v31 }
 0x369   : > { %2384 = vmatpush1.msk.msra.mxu0 %vm1360_vm6, %v1924_v32  ;;  %2389 = vmatmul.mubr.msk.f32.vlgmr.msra.gmra.mrb[10].mxu1 %vm1356_vm7, %v2386_v30 }
 0x36a   : > { %2385 = vmatmul.mubr.msk.f32.vlgmr.msra.gmra.mrb[12].mxu0 %vm1356_vm7, %v2382_v34  ;;  %v2115_v35 = vpop.permute.xlu1 %2114 }
 0x36b   : > { %v2117_v36 = vsel %vm3279_vm0, %v2113_v24, %v2115_v35  ;;  %2189 = vmatprep.mubr.f32.mxu0 %v2648_v0 }
 0x36c   : > { %2391 = vmatprep.subr.msk.mxu0 %vm1360_vm6, %v2117_v36 }
 0x36e   : > { %v2111_v37 = vpop.permute.xlu1 %2110 }
 0x36f   : > { %v2116_v39 = vsel %vm3280_vm2, %v2111_v37, %v2113_v24 }
 0x370   : > { %2392 = vmatpush1.msk.msra.mxu0 %vm1360_vm6, %v2116_v39 }
 0x371   : > { %2393 = vmatmul.mubr.msk.f32.vlgmr.msra.gmra.mrb[14].mxu0 %vm1356_vm7, %v2390_v38 }
 0x377   : > { %v2204_v17 = vpop.permute.xlu0 %2203 }
 0x42d   : > { %v1720_v40 = vpop.f32.mrb[12].mxu1 }
 0x42e   : > { %v1722_v41 = vpop.f32.mrb[13].mxu1  ;;  %v1725_v47 = vmul.f32 %v3045_v57, %v1720_v40 }
 0x42f   : > { %v1726_v50 = vmul.f32 %v3051_v59, %v1722_v41 }
 0x431   : > { %v1431_v42 = vpop.f32.mrb[6].mxu0 }
 0x432   : > { %v1433_v43 = vpop.f32.mrb[7].mxu0  ;;  %v1436_v44 = vmul.f32 %v3045_v57, %v1431_v42 }
 0x433   : > { %v1437_v48 = vmul.f32 %v3051_v59, %v1433_v43 }
 0x435   : > { %v1623_v0 = vpop.f32.mrb[8].mxu0 }
 0x436   : > { %v1628_v45 = vmul.f32 %v3048_v58, %v1623_v0  ;;  %v1625_v46 = vpop.f32.mrb[9].mxu0 }
 0x437   : > { %v1629_v49 = vmul.f32 %v3054_v60, %v1625_v46 }
 0x438   : > { %v2427_v51 = vadd.f32 %v1628_v45, %v1436_v44 }
 0x439   : > { %v2432_v52 = vadd.f32 %v1629_v49, %v1437_v48  ;;  %v1902_v53 = vpop.f32.mrb[10].mxu0 }
 0x43a   : > { %v2428_v54 = vadd.f32 %v2427_v51, %v1725_v47  ;;  %v1907_v55 = vmul.f32 %v3048_v58, %v1902_v53  ;;  %v1904_v56 = vpop.f32.mrb[11].mxu0 }
 0x43b   : > { %v2433_v61 = vadd.f32 %v2432_v52, %v1726_v50  ;;  %v1908_v62 = vmul.f32 %v3054_v60, %v1904_v56 }
 0x43c   : > { %v2429_v63 = vadd.f32 %v2428_v54, %v1907_v55  ;;  %v2096_v1 = vpop.f32.mrb[10].mxu1 }
 0x43d   : > { %v2434_v2 = vadd.f32 %v2433_v61, %v1908_v62  ;;  %v1999_v3 = vpop.f32.mrb[12].mxu0  ;;  %v2098_v4 = vpop.f32.mrb[11].mxu1 }
 0x43e   : > { %v2004_v5 = vmul.f32 %v3045_v57, %v1999_v3  ;;  %v2001_v6 = vpop.f32.mrb[13].mxu0 }
 0x43f   : > { %v2005_v7 = vmul.f32 %v3051_v59, %v2001_v6 }
 0x440   : > { %v2430_v8 = vadd.f32 %v2429_v63, %v2004_v5 }
 0x441   : > { %v2435_v9 = vadd.f32 %v2434_v2, %v2005_v7 }
 0x442   : > { %v2431_v10 = vadd.f32 %v2430_v8, %v2096_v1 }
 0x443   : > { %v2436_v11 = vadd.f32 %v2435_v9, %v2098_v4 }
 0x444   : > { %v2191_v12 = vpop.f32.mrb[14].mxu0 }
 0x445   : > { %v2196_v13 = vmul.f32 %v3048_v58, %v2191_v12  ;;  %v2193_v14 = vpop.f32.mrb[15].mxu0 }
 0x446   : > { %v2197_v15 = vmul.f32 %v3054_v60, %v2193_v14 }
 0x447   : > { %v2198_v16 = vadd.f32 %v2431_v10, %v2196_v13 }
 0x448   : > { %v2199_v57 = vadd.f32 %v2436_v11, %v2197_v15 }
 0x449   : > { %v2206_v18 = vadd.f32 %v2204_v17, %v2198_v16 }
 0x44a   : > { %v2207_v19 = vadd.f32 %v2204_v17, %v2199_v57 }
 0x44b   : > { %v2208_v20 = vmax.f32 %v2206_v18, 0.0 }
 0x44c   : > { %v2209_v59 = vmax.f32 %v2207_v19, 0.0 }
 0x44e   : > { %v2212_v21 = vcombine.low %v2208_v20, %v2209_v59 }
 0x450   : > { %2214 = vst [vmem:[%s331_s18] sm:$0xff] %v2212_v21 }
 0x451   : > { %2587 = shalt.err (!%p2584_p1)
}
 0x452   : > { %s2588_s22 = scalar_lea.hbm %s3199_s0, 128  ;;  %s2592_s21 = scalar_lea.hbm %s3250_s7, 256 }
 0x453   : > { %p2589_p11 = scmp.ne.s32.totalorder %s3199_s0, %s2588_s22  ;;  %p2593_p4 = scmp.lt.u32.totalorder %s3199_s0, %s3250_s7 }
 0x454   : > { %p2594_p10 = scmp.lt.u32.totalorder %s2592_s21, %s2588_s22  ;;  %p2596_p13 = scmp.lt.u32.totalorder %s2588_s22, %s3199_s0 }
 0x455   : > { %p2590_p12 = pnand %p2589_p11, %p3282_p3 }
 0x456   : > { %p2595_p6 = por %p2594_p10, %p2593_p4 }
 0x457   : > { %p2591_p2 = pneg %p2590_p12 }
 0x458   : > { %p2597_p7 = por %p2596_p13, %p2595_p6 }
 0x45a   : > { %p2598_p5 = pnand %p2597_p7, %p2591_p2 }
 0x45c   : > { %2601 = shalt.err (!%p2598_p5)
}
 0x45d   : > { %2453 = dma.vmem_to_hbm [thread:$0]  (%p3282_p3), %s3201_s29, 128, %s3199_s0, %s2216_s9  }
 0x45e PF: > { %s2242_s18 = sand.u32 1, %s2632_s24   ;;  %p3283_p8 = scmp.ne.s32.totalorder %s3264_s14, 0 }
 0x45f   : > { %p3284_p9 = scmp.ge.s32.totalorder %s2644_s27, 2  ;;  %s2243_s23 = scalar_lea.sflag [#allocation6], %s2242_s18 }
 0x461   : > { %p2463_p0 = pnand %p3284_p9, %p3283_p8 }
 0x463   : > { %2627 = dma.done.wait (!%p2463_p0), %s2243_s23, 128  }
 0x464   : > { %2629 = vsyncadd (!%p2463_p0), %s2243_s23, 4294967168  ;;  %p23_p1 = scmp.ge.s32.totalorder %s2724_s30, 4   ;;  %s3285_s24 = smov %s2636_s25 }
 0x465   : > { %s3286_s25 = smov %s2640_s26  ;;  %s3287_s26 = smov %s2736_s10 }
 0x466   : > { %s3288_s27 = smov %s2724_s30  ;;  %25 = sbr.rel (!%p23_p1) target bundleno = 9 (0x9), region = 122 }
 0x46d   :  { %2248 = vsyncpa [#allocation5], 1 }
 0x46e   :  { %2250 = vsyncpa [#allocation5 + $0x1], 1 }
 0x46f   :  { %2251 = vsyncpa [#allocation8], 1 }
 0x470   :  { %2253 = vsyncpa [#allocation8 + $0x1], 1 }
 0x471   :  { %2254 = vsyncpa [#allocation6], 1 }
 0x472   :  { %2256 = vsyncpa [#allocation6 + $0x1], 1 }

</bundles_post_ra>
